<compile_context>
chip_gen: v7x
topology: tpu7x:2x2x1
jax: 0.10.0
libtpu: 0.0.40
codegen_flags: <defaults>
</compile_context>

<pallas_src>
import functools
import math

import jax
import jax.numpy as jnp
import numpy as np
from jax.experimental import pallas as pl
from jax.experimental.pallas import tpu as pltpu


def _same_padding(k: int):
    # Matches Conv2dSamePadding: pad_before = k//2 + (k - 2*(k//2)) - 1, pad_after = k//2
    lo = k // 2 + (k - 2 * (k // 2)) - 1
    hi = k // 2
    return lo, hi


def _build_lhs(x_ref, taps, mb, base):
    """(mb, KT*Cin) bf16 im2col block: KT shifted row-slices of the flat image,
    concatenated along the channel (lane) axis.  Concatenation is done at 32-bit
    lane granularity (f32) and cast back to bf16 for the MXU."""
    parts = [x_ref[0, pl.ds(base + off, mb), :].astype(jnp.float32) for off in taps]
    return jnp.concatenate(parts, axis=-1).astype(jnp.bfloat16)


def _conv_stats_kernel(x_ref, w_ref, mask_ref, stats_ref, *, taps, mb, multi_block):
    """Conv (one folded MXU dot) + per-image BN partial statistics.

    x_ref:     (1, Mx, Cin)       bf16  flattened zero-padded NHWC image
    w_ref:     (KT*Cin, Coutp)    bf16  folded weight matrix (lane-padded Cout)
    mask_ref:  (1, Mb)            f32   1.0 on valid dense-grid positions
    stats_ref: (1, 8, Coutp)      f32   row 0 = sum(y), row 1 = sum(y*y) (valid only)
    """
    r = pl.program_id(1)

    @pl.when(r == 0)
    def _():
        stats_ref[0] = jnp.zeros(stats_ref.shape[1:], stats_ref.dtype)

    base = r * mb if multi_block else 0
    lhs = _build_lhs(x_ref, taps, mb, base)                               # (Mb, KT*Cin) bf16
    y = jnp.dot(lhs, w_ref[...], preferred_element_type=jnp.float32)      # (Mb, Coutp) f32

    # Masked reductions as MXU matvecs (no XLU cross-sublane reduce, no big temps).
    valid = mask_ref[...]                                                 # (1, Mb) f32
    s = jnp.dot(valid, y, preferred_element_type=jnp.float32)             # (1, Coutp)
    ss = jnp.dot(valid, y * y, preferred_element_type=jnp.float32)        # (1, Coutp)
    upd = jnp.concatenate(
        [s, ss, jnp.zeros((6, s.shape[1]), jnp.float32)], axis=0)         # (8, Coutp)
    stats_ref[0] = stats_ref[0] + upd


def _conv_bn_relu_kernel(x_ref, w_ref, scale_ref, shift_ref, o_ref, *,
                         taps, mb, multi_block):
    """Recompute the conv block (cheap, memory-bound) and apply BN + ReLU fused."""
    base = pl.program_id(1) * mb if multi_block else 0
    lhs = _build_lhs(x_ref, taps, mb, base)
    y = jnp.dot(lhs, w_ref[...], preferred_element_type=jnp.float32)      # (Mb, Coutp) f32
    o_ref[0] = jnp.maximum(y * scale_ref[...] + shift_ref[...], 0.0)


def relu_conv2d(x, weight, gamma, beta, *, stride=1, eps=1e-5):
    """x: [N, Cin, H, W], weight: [Cout, Cin, KH, KW], gamma/beta: [Cout] -> [N, Cout, Ho, Wo]."""
    N, Cin, H, W = x.shape
    Cout, Cin_w, KH, KW = weight.shape
    assert Cin == Cin_w

    ph_lo, ph_hi = _same_padding(KH)
    pw_lo, pw_hi = _same_padding(KW)
    Hp = H + ph_lo + ph_hi
    Wp = W + pw_lo + pw_hi
    Ho = (Hp - KH) // stride + 1
    Wo = (Wp - KW) // stride + 1
    Hv = (Ho - 1) * stride + 1            # dense (stride-1) row grid actually computed
    KT = KH * KW
    KTC = KT * Cin
    Coutp = ((Cout + 127) // 128) * 128   # lane-dense output channels

    # ---- dense-grid row-block tiling (VMEM sizing + software pipelining) ----
    # per dense row of a block: conv out + y temp (f32) + f32/bf16 im2col LHS temps
    per_row_bytes = Wp * (Coutp * 8 + KTC * 6)
    rows_per_block = max(1, min(Hv, (4 * 1024 * 1024) // per_row_bytes))
    if rows_per_block < Hv:
        g = 8 // math.gcd(Wp, 8)          # keep Mb = rows*Wp a multiple of 8 sublanes
        rows_per_block = min(Hv, ((rows_per_block + g - 1) // g) * g)
    if rows_per_block >= Hv:
        rows_per_block, Hv_pad = Hv, Hv
    else:
        Hv_pad = ((Hv + rows_per_block - 1) // rows_per_block) * rows_per_block
    n_rb = Hv_pad // rows_per_block
    Mb = rows_per_block * Wp
    Mv_pad = Hv_pad * Wp
    multi_block = n_rb > 1

    # ---- glue: channels-last bf16, zero padding (same padding + guard rows) ----
    extra = 1 if KW > 1 else 0            # shifted flat reads stay in-bounds
    Hp_total = max(Hp, Hv_pad + KH - 1) + extra
    Mx = Hp_total * Wp
    x_nhwc = jnp.transpose(x, (0, 2, 3, 1)).astype(jnp.bfloat16)
    x_pad = jnp.pad(x_nhwc, ((0, 0), (ph_lo, Hp_total - H - ph_lo), (pw_lo, pw_hi), (0, 0)))
    # TODO(synk): the whole (zero-padded) image is kept in VMEM per step; very large
    # feature maps would want a haloed row-window for x as well.
    x2d = x_pad.reshape(N, Mx, Cin)

    # weights: (Cout, Cin, KH, KW) -> (KH*KW*Cin, Coutp), tap-major rows matching the
    # in-kernel LHS concatenation order.
    w2d = jnp.transpose(weight, (2, 3, 1, 0)).reshape(KTC, Cout)
    w2d = jnp.pad(w2d, ((0, 0), (0, Coutp - Cout))).astype(jnp.bfloat16)

    taps = tuple(kh * Wp + kw for kh in range(KH) for kw in range(KW))

    # Host-precomputed validity of every dense-grid position (drops horizontal wrap
    # columns, padded rows, and for stride>1 the skipped positions).
    rows = np.arange(Hv_pad)
    cols = np.arange(Wp)
    row_ok = (rows % stride == 0) & (rows // stride < Ho)
    col_ok = (cols % stride == 0) & (cols // stride < Wo)
    mask = jnp.asarray((row_ok[:, None] & col_ok[None, :])
                       .astype(np.float32).reshape(n_rb, Mb))

    # ---- kernel 1: conv + per-image BN partial sums ----
    flops1 = 2 * N * n_rb * Mb * KTC * Coutp
    bytes1 = N * Mx * Cin * 2 + KTC * Coutp * 2 + N * n_rb * Mb * 4 + N * 8 * Coutp * 4
    stats = pl.pallas_call(
        functools.partial(_conv_stats_kernel, taps=taps, mb=Mb, multi_block=multi_block),
        out_shape=jax.ShapeDtypeStruct((N, 8, Coutp), jnp.float32),
        grid=(N, n_rb),
        in_specs=[
            pl.BlockSpec((1, Mx, Cin), lambda n, r: (n, 0, 0)),
            pl.BlockSpec((KTC, Coutp), lambda n, r: (0, 0)),
            pl.BlockSpec((1, Mb), lambda n, r: (r, 0)),
        ],
        out_specs=pl.BlockSpec((1, 8, Coutp), lambda n, r: (n, 0, 0)),
        compiler_params=pltpu.CompilerParams(
            dimension_semantics=("parallel", "arbitrary"),
            vmem_limit_bytes=32 * 1024 * 1024),
        cost_estimate=pl.CostEstimate(flops=flops1, transcendentals=0,
                                      bytes_accessed=bytes1),
    )(x2d, w2d, mask)

    # ---- tiny JAX reduction: global batch stats -> per-channel scale/shift (hoisted) ----
    cnt = float(N * Ho * Wo)
    mu = jnp.sum(stats[:, 0, :], axis=0) / cnt                            # (Coutp,)
    var = jnp.maximum(jnp.sum(stats[:, 1, :], axis=0) / cnt - mu * mu, 0.0)
    # TODO(synk): E[y^2]-E[y]^2 in f32 can lose precision for very large activations;
    # a Welford-style combine of the per-image partials would be more robust.
    g = jnp.pad(gamma.astype(jnp.float32), (0, Coutp - Cout))
    b = jnp.pad(beta.astype(jnp.float32), (0, Coutp - Cout))
    scale_vec = g * jax.lax.rsqrt(var + eps)
    shift_vec = b - mu * scale_vec
    scale = scale_vec.reshape(1, Coutp)
    shift = shift_vec.reshape(1, Coutp)

    # ---- kernel 2: conv recompute + BN + ReLU fused (no dense intermediate) ----
    flops2 = 2 * N * n_rb * Mb * KTC * Coutp
    bytes2 = N * Mx * Cin * 2 + KTC * Coutp * 2 + N * Mv_pad * Coutp * 4
    out_flat = pl.pallas_call(
        functools.partial(_conv_bn_relu_kernel, taps=taps, mb=Mb, multi_block=multi_block),
        out_shape=jax.ShapeDtypeStruct((N, Mv_pad, Coutp), jnp.float32),
        grid=(N, n_rb),
        in_specs=[
            pl.BlockSpec((1, Mx, Cin), lambda n, r: (n, 0, 0)),
            pl.BlockSpec((KTC, Coutp), lambda n, r: (0, 0)),
            pl.BlockSpec((1, Coutp), lambda n, r: (0, 0)),
            pl.BlockSpec((1, Coutp), lambda n, r: (0, 0)),
        ],
        out_specs=pl.BlockSpec((1, Mb, Coutp), lambda n, r: (n, r, 0)),
        compiler_params=pltpu.CompilerParams(
            dimension_semantics=("parallel", "parallel"),
            vmem_limit_bytes=32 * 1024 * 1024),
        cost_estimate=pl.CostEstimate(flops=flops2, transcendentals=0,
                                      bytes_accessed=bytes2),
    )(x2d, w2d, scale, shift)

    # ---- glue: drop wrap columns / channel padding / stride subsample, back to NCHW ----
    # TODO(synk): the strided trim + NCHW transpose is one fused XLA copy; it could be
    # folded into kernel 2 (valid-row / NCHW stores) at the cost of an in-kernel relayout.
    out = out_flat.reshape(N, Hv_pad, Wp, Coutp)
    out = out[:, 0:(Ho - 1) * stride + 1:stride, 0:(Wo - 1) * stride + 1:stride, :Cout]
    return jnp.transpose(out, (0, 3, 1, 2))


def _reference(x, weight, gamma, beta, *, stride=1, eps=1e-5, matmul_dtype=jnp.float32):
    """Pure-JAX mirror of the PyTorch module (training-mode BN).

    matmul_dtype=bfloat16 mirrors the kernel's MXU operand rounding (f32 accumulation).
    """
    KH, KW = weight.shape[2], weight.shape[3]
    ph = _same_padding(KH)
    pw = _same_padding(KW)
    prec = jax.lax.Precision.HIGHEST if matmul_dtype == jnp.float32 else None
    y = jax.lax.conv_general_dilated(
        x.astype(matmul_dtype), weight.astype(matmul_dtype),
        window_strides=(stride, stride), padding=(ph, pw),
        dimension_numbers=("NCHW", "OIHW", "NCHW"),
        preferred_element_type=jnp.float32, precision=prec)
    mu = jnp.mean(y, axis=(0, 2, 3), keepdims=True)
    var = jnp.mean((y - mu) ** 2, axis=(0, 2, 3), keepdims=True)
    yn = (y - mu) * jax.lax.rsqrt(var + eps) * gamma.reshape(1, -1, 1, 1) \
        + beta.reshape(1, -1, 1, 1)
    return jnp.maximum(yn, 0.0)


if __name__ == "__main__":
    key = jax.random.PRNGKey(0)
    k_x, k_w, k_g, k_b = jax.random.split(key, 4)

    N, Cin, H, W = 2, 4, 16, 16
    Cout, ksize, stride = 8, 3, 1

    x = jax.random.normal(k_x, (N, Cin, H, W), dtype=jnp.float32)
    weight = jax.random.normal(k_w, (Cout, Cin, ksize, ksize), dtype=jnp.float32) * 0.1
    gamma = 1.0 + 0.1 * jax.random.normal(k_g, (Cout,), dtype=jnp.float32)
    beta = 0.1 * jax.random.normal(k_b, (Cout,), dtype=jnp.float32)
    # TODO(synk): BatchNorm running_mean/running_var momentum updates are training-time
    # buffer side effects that do not affect the returned tensor; not modeled here.

    out = jax.block_until_ready(relu_conv2d(x, weight, gamma, beta, stride=stride))

    # Numerics-matched reference (same bf16 MXU operand rounding, f32 accumulation).
    ref_bf16 = jax.block_until_ready(
        _reference(x, weight, gamma, beta, stride=stride, matmul_dtype=jnp.bfloat16))
    np.testing.assert_allclose(np.asarray(out), np.asarray(ref_bf16), rtol=5e-3, atol=5e-3)

    # Loose sanity check against the full-f32 HIGHEST reference.
    ref_f32 = jax.block_until_ready(
        _reference(x, weight, gamma, beta, stride=stride, matmul_dtype=jnp.float32))
    np.testing.assert_allclose(np.asarray(out), np.asarray(ref_f32), rtol=5e-2, atol=5e-2)

    # Even kernel size + stride 2 exercises the asymmetric same-padding and stride masking.
    w2 = jax.random.normal(k_w, (Cout, Cin, 2, 2), dtype=jnp.float32) * 0.1
    out2 = jax.block_until_ready(relu_conv2d(x, w2, gamma, beta, stride=2))
    ref2 = jax.block_until_ready(
        _reference(x, w2, gamma, beta, stride=2, matmul_dtype=jnp.bfloat16))
    np.testing.assert_allclose(np.asarray(out2), np.asarray(ref2), rtol=5e-3, atol=5e-3)

    print("KERNEL_OK")
</pallas_src>

<mosaic_0001>
module attributes {stable_mosaic.version = 11 : i64} {
  func.func @_conv_stats_kernel(%arg0: i32, %arg1: i32, %arg2: memref<1x342x4xbf16, #tpu.memory_space<vmem>>, %arg3: memref<36x128xbf16, #tpu.memory_space<vmem>>, %arg4: memref<1x288xf32, #tpu.memory_space<vmem>>, %arg5: memref<1x8x128xf32, #tpu.memory_space<vmem>>) attributes {dimension_semantics = [#tpu.dimension_semantics<parallel>, #tpu.dimension_semantics<arbitrary>], iteration_bounds = array<i64: 2, 1>, scalar_prefetch = 0 : i64, scratch_operands = 0 : i64, tpu.core_type = #tpu.core_type<tc>, window_params = [{transform_indices = @transform_0, window_bounds = array<i64: 1, 342, 4>}, {pipeline_mode = #tpu.pipeline_mode<synchronous>, transform_indices = @transform_1, window_bounds = array<i64: 36, 128>}, {transform_indices = @transform_2, window_bounds = array<i64: 1, 288>}, {transform_indices = @transform_3, window_bounds = array<i64: 1, 8, 128>}]} {
    %c0_i32 = arith.constant 0 : i32
    %0 = arith.cmpi eq, %arg1, %c0_i32 : i32
    %1 = arith.extui %0 : i1 to i32
    %c0_i32_0 = arith.constant 0 : i32
    %2 = arith.cmpi ne, %1, %c0_i32_0 : i32
    scf.if %2 {
      %cst_32 = arith.constant 0.000000e+00 : f32
      %46 = vector.broadcast %cst_32 : f32 to vector<8x128xf32>
      %c0_33 = arith.constant 0 : index
      %c0_34 = arith.constant 0 : index
      %c0_35 = arith.constant 0 : index
      %47 = vector.load %arg5[%c0_33, %c0_34, %c0_35] : memref<1x8x128xf32, #tpu.memory_space<vmem>>, vector<1x8x128xf32>
      %48 = vector.shape_cast %47 : vector<1x8x128xf32> to vector<8x128xf32>
      %49 = vector.shape_cast %46 : vector<8x128xf32> to vector<1x8x128xf32>
      tpu.vector_store %arg5[%c0_33, %c0_34, %c0_35], %49 {strides = array<i32>} : memref<1x8x128xf32, #tpu.memory_space<vmem>>, vector<1x8x128xf32>,
    } else {
    }
    %c0 = arith.constant 0 : index
    %c0_1 = arith.constant 0 : index
    %c0_2 = arith.constant 0 : index
    %3 = vector.load %arg2[%c0, %c0_1, %c0_2] : memref<1x342x4xbf16, #tpu.memory_space<vmem>>, vector<1x288x4xbf16>
    %4 = vector.shape_cast %3 : vector<1x288x4xbf16> to vector<288x4xbf16>
    %5 = arith.extf %4 : vector<288x4xbf16> to vector<288x4xf32>
    %c0_3 = arith.constant 0 : index
    %c1 = arith.constant 1 : index
    %c0_4 = arith.constant 0 : index
    %6 = vector.load %arg2[%c0_3, %c1, %c0_4] : memref<1x342x4xbf16, #tpu.memory_space<vmem>>, vector<1x288x4xbf16>
    %7 = vector.shape_cast %6 : vector<1x288x4xbf16> to vector<288x4xbf16>
    %8 = arith.extf %7 : vector<288x4xbf16> to vector<288x4xf32>
    %c0_5 = arith.constant 0 : index
    %c2 = arith.constant 2 : index
    %c0_6 = arith.constant 0 : index
    %9 = vector.load %arg2[%c0_5, %c2, %c0_6] : memref<1x342x4xbf16, #tpu.memory_space<vmem>>, vector<1x288x4xbf16>
    %10 = vector.shape_cast %9 : vector<1x288x4xbf16> to vector<288x4xbf16>
    %11 = arith.extf %10 : vector<288x4xbf16> to vector<288x4xf32>
    %c0_7 = arith.constant 0 : index
    %c18 = arith.constant 18 : index
    %c0_8 = arith.constant 0 : index
    %12 = vector.load %arg2[%c0_7, %c18, %c0_8] : memref<1x342x4xbf16, #tpu.memory_space<vmem>>, vector<1x288x4xbf16>
    %13 = vector.shape_cast %12 : vector<1x288x4xbf16> to vector<288x4xbf16>
    %14 = arith.extf %13 : vector<288x4xbf16> to vector<288x4xf32>
    %c0_9 = arith.constant 0 : index
    %c19 = arith.constant 19 : index
    %c0_10 = arith.constant 0 : index
    %15 = vector.load %arg2[%c0_9, %c19, %c0_10] : memref<1x342x4xbf16, #tpu.memory_space<vmem>>, vector<1x288x4xbf16>
    %16 = vector.shape_cast %15 : vector<1x288x4xbf16> to vector<288x4xbf16>
    %17 = arith.extf %16 : vector<288x4xbf16> to vector<288x4xf32>
    %c0_11 = arith.constant 0 : index
    %c20 = arith.constant 20 : index
    %c0_12 = arith.constant 0 : index
    %18 = vector.load %arg2[%c0_11, %c20, %c0_12] : memref<1x342x4xbf16, #tpu.memory_space<vmem>>, vector<1x288x4xbf16>
    %19 = vector.shape_cast %18 : vector<1x288x4xbf16> to vector<288x4xbf16>
    %20 = arith.extf %19 : vector<288x4xbf16> to vector<288x4xf32>
    %c0_13 = arith.constant 0 : index
    %c36 = arith.constant 36 : index
    %c0_14 = arith.constant 0 : index
    %21 = vector.load %arg2[%c0_13, %c36, %c0_14] : memref<1x342x4xbf16, #tpu.memory_space<vmem>>, vector<1x288x4xbf16>
    %22 = vector.shape_cast %21 : vector<1x288x4xbf16> to vector<288x4xbf16>
    %23 = arith.extf %22 : vector<288x4xbf16> to vector<288x4xf32>
    %c0_15 = arith.constant 0 : index
    %c37 = arith.constant 37 : index
    %c0_16 = arith.constant 0 : index
    %24 = vector.load %arg2[%c0_15, %c37, %c0_16] : memref<1x342x4xbf16, #tpu.memory_space<vmem>>, vector<1x288x4xbf16>
    %25 = vector.shape_cast %24 : vector<1x288x4xbf16> to vector<288x4xbf16>
    %26 = arith.extf %25 : vector<288x4xbf16> to vector<288x4xf32>
    %c0_17 = arith.constant 0 : index
    %c38 = arith.constant 38 : index
    %c0_18 = arith.constant 0 : index
    %27 = vector.load %arg2[%c0_17, %c38, %c0_18] : memref<1x342x4xbf16, #tpu.memory_space<vmem>>, vector<1x288x4xbf16>
    %28 = vector.shape_cast %27 : vector<1x288x4xbf16> to vector<288x4xbf16>
    %29 = arith.extf %28 : vector<288x4xbf16> to vector<288x4xf32>
    %30 = tpu.concatenate %5, %8, %11, %14, %17, %20, %23, %26, %29 in 1 : vector<288x4xf32>, vector<288x4xf32>, vector<288x4xf32>, vector<288x4xf32>, vector<288x4xf32>, vector<288x4xf32>, vector<288x4xf32>, vector<288x4xf32>, vector<288x4xf32> -> vector<288x36xf32>
    %31 = arith.truncf %30 : vector<288x36xf32> to vector<288x36xbf16>
    %c0_19 = arith.constant 0 : index
    %c0_20 = arith.constant 0 : index
    %32 = vector.load %arg3[%c0_19, %c0_20] : memref<36x128xbf16, #tpu.memory_space<vmem>>, vector<36x128xbf16>
    %cst = arith.constant dense<0.000000e+00> : vector<288x128xf32>
    %33 = tpu.matmul %31, %32, %cst {dimension_numbers = #tpu.dot_dimension_numbers<[1], [0], [0], [1], [0, 0, 1, 1], [], []>} : vector<288x36xbf16>, vector<36x128xbf16>, vector<288x128xf32> -> vector<288x128xf32>
    %c0_21 = arith.constant 0 : index
    %c0_22 = arith.constant 0 : index
    %34 = vector.load %arg4[%c0_21, %c0_22] : memref<1x288xf32, #tpu.memory_space<vmem>>, vector<1x288xf32>
    %cst_23 = arith.constant dense<0.000000e+00> : vector<1x128xf32>
    %35 = tpu.matmul %34, %33, %cst_23 {dimension_numbers = #tpu.dot_dimension_numbers<[1], [0], [0], [1], [0, 0, 1, 1], [], []>} : vector<1x288xf32>, vector<288x128xf32>, vector<1x128xf32> -> vector<1x128xf32>
    %36 = arith.mulf %33, %33 : vector<288x128xf32>
    %cst_24 = arith.constant dense<0.000000e+00> : vector<1x128xf32>
    %37 = tpu.matmul %34, %36, %cst_24 {dimension_numbers = #tpu.dot_dimension_numbers<[1], [0], [0], [1], [0, 0, 1, 1], [], []>} : vector<1x288xf32>, vector<288x128xf32>, vector<1x128xf32> -> vector<1x128xf32>
    %cst_25 = arith.constant 0.000000e+00 : f32
    %38 = vector.broadcast %cst_25 : f32 to vector<6x128xf32>
    %39 = tpu.concatenate %35, %37, %38 in 0 : vector<1x128xf32>, vector<1x128xf32>, vector<6x128xf32> -> vector<8x128xf32>
    %c0_26 = arith.constant 0 : index
    %c0_27 = arith.constant 0 : index
    %c0_28 = arith.constant 0 : index
    %40 = vector.load %arg5[%c0_26, %c0_27, %c0_28] : memref<1x8x128xf32, #tpu.memory_space<vmem>>, vector<1x8x128xf32>
    %41 = vector.shape_cast %40 : vector<1x8x128xf32> to vector<8x128xf32>
    %42 = arith.addf %41, %39 : vector<8x128xf32>
    %c0_29 = arith.constant 0 : index
    %c0_30 = arith.constant 0 : index
    %c0_31 = arith.constant 0 : index
    %43 = vector.load %arg5[%c0_29, %c0_30, %c0_31] : memref<1x8x128xf32, #tpu.memory_space<vmem>>, vector<1x8x128xf32>
    %44 = vector.shape_cast %43 : vector<1x8x128xf32> to vector<8x128xf32>
    %45 = vector.shape_cast %42 : vector<8x128xf32> to vector<1x8x128xf32>
    tpu.vector_store %arg5[%c0_29, %c0_30, %c0_31], %45 {strides = array<i32>} : memref<1x8x128xf32, #tpu.memory_space<vmem>>, vector<1x8x128xf32>,
    return
  }
  func.func @transform_0(%arg0: i32, %arg1: i32) -> (i32, i32, i32) {
    %c0_i32 = arith.constant 0 : i32
    %c0_i32_0 = arith.constant 0 : i32
    %c0_i32_1 = arith.constant 0 : i32
    return %arg0, %c0_i32, %c0_i32_0 : i32, i32, i32
  }
  func.func @transform_1(%arg0: i32, %arg1: i32) -> (i32, i32) {
    %c0_i32 = arith.constant 0 : i32
    %c0_i32_0 = arith.constant 0 : i32
    %c0_i32_1 = arith.constant 0 : i32
    return %c0_i32, %c0_i32_0 : i32, i32
  }
  func.func @transform_2(%arg0: i32, %arg1: i32) -> (i32, i32) {
    %c0_i32 = arith.constant 0 : i32
    %c0_i32_0 = arith.constant 0 : i32
    return %arg1, %c0_i32 : i32, i32
  }
  func.func @transform_3(%arg0: i32, %arg1: i32) -> (i32, i32, i32) {
    %c0_i32 = arith.constant 0 : i32
    %c0_i32_0 = arith.constant 0 : i32
    %c0_i32_1 = arith.constant 0 : i32
    return %arg0, %c0_i32, %c0_i32_0 : i32, i32, i32
  }
}

</mosaic_0001>

<bundles_post_ra>
// kernel: tpu_custom_call.1
= control target key start
LH: loop header
LB: loop body
LE: loop exit
PB: predicated region body
PF: predicated region fallthrough
CT: control target
= control target key end

     0   :  { %8 = vsyncpa [#allocation3], 0  ;;  %s6404_s0 = inlined_call_operand.vmem [shape: bf16[2,342,4], index: 0, kind: input, shape index: {}]   ;;  %s6405_s1 = inlined_call_operand.vmem [shape: bf16[36,128], index: 1, kind: input, shape index: {}]   ;;  %s6406_s2 = inlined_call_operand.vmem [shape: f32[1,288], index: 2, kind: input, shape index: {}]   ;;  %s6407_s3 = inlined_call_operand.hbm [shape: f32[2,8,128], index: 3, kind: output, shape index: {}]  }
   0x1   :  { %10 = vsyncpa [#allocation3 + $0x1], 0  ;;  %s3964_s12 = smov 0   ;;  %s3966_s13 = smov 0  }
   0x2   :  { %s3968_s14 = smov 0   ;;  %s3970_s15 = smov 0  }
   0x3   :  { %s3972_s16 = smov 0   ;;  %s3974_s17 = smov 0  }
   0x4 LB: > { %s2686_s18 = sadd.s32 4294967295, %s3930_s17   ;;  %s2687_s19 = sadd.s32 4294967294, %s3930_s17   ;;  %s3930_s17 = sphi %s3974_s17, %s16_s17   ;;  %s3926_s16 = sphi %s3972_s16, %s6567_s16   ;;  %s3922_s15 = sphi %s3970_s15, %s6566_s15   ;;  %s3918_s14 = sphi %s3968_s14, %s6565_s14   ;;  %s3914_s13 = sphi %s3966_s13, %s6564_s13   ;;  %s3910_s12 = sphi %s3964_s12, %s6563_s12  }
   0x5   : > { %s28_s20 = sadd.s32 1, %s3926_s16  ;;  %s108_s21 = sadd.s32 1, %s3918_s14 }
   0x6   : > { %p30_p0 = scmp.ge.s32.totalorder %s28_s20, 2  ;;  %p118_p1 = scmp.ne.s32.totalorder %s3918_s14, %s3914_s13 }
   0x7   : > { %p119_p2 = scmp.eq.s32.totalorder %s2686_s18, 1  ;;  %p124_p3 = scmp.ne.s32.totalorder %s3914_s13, %s3910_s12 }
   0x8   : > { %s6569_s20 = smov (%p30_p0, %s28_s20), 0  ;;  %p125_p5 = scmp.eq.s32.totalorder %s2687_s19, 1 }
   0x9   : > { %p4004_p4 = por %p119_p2, %p118_p1  ;;  %s105_s23 = ssub.s32 %s3926_s16, %s6569_s20 }
   0xa   : > { %p2691_p6 = scmp.ge.s32.totalorder %s3930_s17, 1  ;;  %p106_p7 = scmp.eq.s32.totalorder %s105_s23, 0 }
   0xb   : > { %p4011_p8 = por %p125_p5, %p124_p3  ;;  %p161_p9 = scmp.lt.s32.totalorder %s3930_s17, 3 }
   0xc   : > { %s4017_s25 = scalar_select %p106_p7, %s3918_s14, %s108_s21  }
   0xd   : > { %p162_p10 = pnand %p2691_p6, %p161_p9 }
   0xf   : > { %165 = sbr.rel (%p162_p10) target bundleno = 944 (0x3b0), region = 32 }
  0x16   : > { %p189_p11 = scmp.lt.s32.totalorder %s3922_s15, 1  ;;  %vm524_vm0 = vcmask 1045504   ;;  %vm341_vm1 = vcmask 1046528   ;;  %vm827_vm2 = vcmask 1044480   ;;  %s3932_s4 = smov 8   ;;  %vm1010_vm3 = vcmask 1043456  }
  0x17   : > { %s3933_s5 = smov 4   ;;  %s3934_s6 = smov 12   ;;  %vm1313_vm4 = vcmask 1042432   ;;  %vm1496_vm5 = vcmask 1041408   ;;  %vm1678_vm6 = vcmask 31744   ;;  %vm1715_vm7 = vcmask 64512  }
  0x18   : > { %s190_s26 = scalar_select %p189_p11, %s3922_s15, 1  ;;  %vm1752_vm8 = vcmask 97280   ;;  %vm1789_vm9 = vcmask 130048   ;;  %vm1826_vm10 = vcmask 162816   ;;  %vm1863_vm11 = vcmask 195584  }
  0x19   : > { %s3935_s9 = smov 16   ;;  %s3936_s18 = smov 20   ;;  %vm1900_vm12 = vcmask 228352   ;;  %vm1937_vm13 = vcmask 261120   ;;  %vm2012_vm14 = vcmask 293888   ;;  %vm3941_vm15 = vmmov 0  }
  0x1a   : > { %s3062_s27 = smul.u32 172, %s190_s26  ;;  %s3937_s23 = smov 24  }
  0x1b   : > { %s3938_s26 = smov 28  }
  0x1c   : > { %s4024_s30 = scalar_lea.vmem %s6404_s0, %s3062_s27  ;;  %s3939_s27 = smov 32  }
  0x1d   : > { %v4027_v0 = vld [vmem:[%s4024_s30] sm:$0xff]   ;;  %v2801_v1 = vld [vmem:[%s4024_s30 + $0x8] sm:$0xff]   ;;  %v2802_v7 = vld [vmem:[%s4024_s30 + $0x10] sm:$0xff]  }
  0x1e   : > { %v278_v2 = vld [vmem:[%s4024_s30] sm:$0xe]  ;;  %v4032_v3 = vunpack.c.h.bf16 %v4027_v0  ;;  %v4034_v4 = vunpack.c.l.bf16 %v2801_v1  ;;  %v4036_v5 = vunpack.c.h.bf16 %v2801_v1  ;;  %v2803_v8 = vld [vmem:[%s4024_s30 + $0x18] sm:$0xff]   ;;  %v6408_v9 = vunpack.c.l.bf16 %v4027_v0  ;;  %v280_v29 = vld [vmem:[%s4024_s30 + $0x8] sm:$0xe] }
  0x1f   : > { %v279_v6 = vunpack.c.l.bf16 %v278_v2  ;;  %v4041_v10 = vunpack.c.l.bf16 %v2802_v7  ;;  %v4043_v11 = vunpack.c.h.bf16 %v2802_v7  ;;  %v4045_v12 = vunpack.c.l.bf16 %v2803_v8  ;;  %v290_v45 = vld [vmem:[%s4024_s30 + $0x8] sm:$0xc]  ;;  %v4095_v57 = vld [vmem:[%s4024_s30 + $0x20] sm:$0xff]   ;;  %v292_v58 = vld [vmem:[%s4024_s30 + $0x10] sm:$0xc] }
  0x20   : > { %v526_v14 = vrot.slane %v4032_v3, 2  ;;  %v528_v15 = vrot.slane %v4034_v4, 2  ;;  %v343_v16 = vrot.slane %v4032_v3, 1  ;;  %v342_v17 = vrot.slane %v6408_v9, 1 }
  0x21   : > { %v525_v13 = vrot.slane %v279_v6, 2  ;;  %v345_v18 = vrot.slane %v4034_v4, 1  ;;  %v530_v19 = vrot.slane %v4036_v5, 2  ;;  %v532_v20 = vrot.slane %v4041_v10, 2 }
  0x22   : > { %v529_v22 = vsel %vm524_vm0, %v526_v14, %v528_v15  ;;  %v347_v23 = vrot.slane %v4036_v5, 1  ;;  %v349_v24 = vrot.slane %v4041_v10, 1  ;;  %v344_v26 = vsel %vm341_vm1, %v342_v17, %v343_v16 }
  0x23   : > { %v527_v21 = vsel %vm524_vm0, %v525_v13, %v526_v14  ;;  %v346_v27 = vsel %vm341_vm1, %v343_v16, %v345_v18  ;;  %v531_v28 = vsel %vm524_vm0, %v528_v15, %v530_v19  ;;  %v533_v31 = vsel %vm524_vm0, %v530_v19, %v532_v20 }
  0x24   : > { %v3139_v25 = vpack.i.bf16 %v529_v22, %v527_v21  ;;  %v3129_v30 = vpack.i.bf16 %v346_v27, %v344_v26  ;;  %v348_v32 = vsel %vm341_vm1, %v345_v18, %v347_v23  ;;  %v350_v33 = vsel %vm341_vm1, %v347_v23, %v349_v24 }
  0x25   : > { %v3144_v34 = vpack.i.bf16 %v533_v31, %v531_v28  ;;  %v3134_v35 = vpack.i.bf16 %v350_v33, %v348_v32  ;;  %v534_v36 = vrot.slane %v4043_v11, 2  ;;  %v536_v37 = vrot.slane %v4045_v12, 2 }
  0x26   : > { %3140 = vrot.lane.b32.xlu1 %v3139_v25, %s3932_s4  ;;  %3130 = vrot.lane.b32.xlu0 %v3129_v30, %s3933_s5  ;;  %v284_v38 = vunpack.c.l.bf16 %v280_v29  ;;  %v831_v39 = vrot.slane %v4041_v10, 3  ;;  %v833_v40 = vrot.slane %v4043_v11, 3  ;;  %v835_v41 = vrot.slane %v4045_v12, 3  ;;  %v302_v25 = vld [vmem:[%s4024_s30 + $0x10] sm:$0x8] }
  0x27   : > { %v535_v42 = vsel %vm524_vm0, %v532_v20, %v534_v36  ;;  %v537_v43 = vsel %vm524_vm0, %v534_v36, %v536_v37  ;;  %v829_v44 = vrot.slane %v4036_v5, 3  ;;  %v1014_v48 = vrot.slane %v4041_v10, 4 }
  0x28   : > { %v4081_v46 = vpack.i.bf16 %v537_v43, %v535_v42  ;;  %v710_v47 = vrot.slane %v284_v38, 2  ;;  %v834_v49 = vsel %vm827_vm2, %v831_v39, %v833_v40  ;;  %v836_v50 = vsel %vm827_vm2, %v833_v40, %v835_v41 }
  0x29   : > { %v828_v51 = vrot.slane %v284_v38, 3  ;;  %v832_v52 = vsel %vm827_vm2, %v829_v44, %v831_v39  ;;  %v1016_v54 = vrot.slane %v4043_v11, 4  ;;  %v1018_v55 = vrot.slane %v4045_v12, 4 }
  0x2a   : > { %3145 = vrot.lane.b32.xlu1 %v3144_v34, %s3932_s4  ;;  %3135 = vrot.lane.b32.xlu0 %v3134_v35, %s3933_s5  ;;  %v711_v53 = vsel %vm524_vm0, %v710_v47, %v530_v19  ;;  %v291_v56 = vunpack.c.l.bf16 %v290_v45  ;;  %v1012_v61 = vrot.slane %v4036_v5, 4  ;;  %v4100_v62 = vunpack.c.h.bf16 %v2803_v8  ;;  %v3849_v19 = vld [vmem:[%s6405_s1] sm:$0xff]   ;;  %v3850_v34 = vld [vmem:[%s6405_s1 + $0x8] sm:$0xff]  }
  0x2b   : > { %v3149_v59 = vpack.i.bf16 %v533_v31, %v711_v53  ;;  %v830_v60 = vsel %vm827_vm2, %v828_v51, %v829_v44  ;;  %v3164_v1 = vpack.i.bf16 %v836_v50, %v834_v49  ;;  %v4105_v2 = vunpack.c.l.bf16 %v4095_v57  ;;  %2921 = vmatprep.subr.bf16.mxu0 %v3849_v19  ;;  %v4152_v50 = vld [vmem:[%s6405_s1 + $0x10] ss:$0 sps:$4 sm:$0x33]  }
  0x2c   : > { %v1011_v63 = vrot.slane %v291_v56, 4  ;;  %v296_v6 = vunpack.c.l.bf16 %v292_v58  ;;  %v3159_v7 = vpack.i.bf16 %v832_v52, %v830_v60  ;;  %v1017_v13 = vsel %vm1010_vm3, %v1014_v48, %v1016_v54  ;;  %2922 = vmatpush3.bf16.msra.mxu0 %v3849_v19 }
  0x2d   : > { %v1019_v14 = vsel %vm1010_vm3, %v1016_v54, %v1018_v55  ;;  %v1020_v8 = vrot.slane %v4100_v62, 4  ;;  %v1015_v16 = vsel %vm1010_vm3, %v1012_v61, %v1014_v48  ;;  %v1022_v17 = vrot.slane %v4105_v2, 4  ;;  %2923 = vmatprep.subr.bf16.mxu0 %v3850_v34 }
  0x2e   : > { %3155 = vrot.lane.b32.xlu1 %v4081_v46, %s3934_s6  ;;  %3150 = vrot.lane.b32.xlu0 %v3149_v59, %s3934_s6  ;;  %v1013_v15 = vsel %vm1010_vm3, %v1011_v63, %v1012_v61  ;;  %v1196_v18 = vrot.slane %v296_v6, 4  ;;  %v3174_v20 = vpack.i.bf16 %v1019_v14, %v1017_v13  ;;  %v1317_v21 = vrot.slane %v4045_v12, 5  ;;  %v2805_v59 = vld [vmem:[%s4024_s30 + $0x28] sm:$0xff]  }
  0x2f   : > { %v1319_v22 = vrot.slane %v4100_v62, 5  ;;  %v1321_v23 = vrot.slane %v4105_v2, 5  ;;  %v3169_v26 = vpack.i.bf16 %v1015_v16, %v1013_v15  ;;  %v1021_v27 = vsel %vm1010_vm3, %v1018_v55, %v1020_v8 }
  0x30   : > { %v1023_v28 = vsel %vm1010_vm3, %v1020_v8, %v1022_v17  ;;  %v1315_v29 = vrot.slane %v4043_v11, 5  ;;  %v1197_v30 = vsel %vm1010_vm3, %v1196_v18, %v1016_v54  ;;  %v1314_v31 = vrot.slane %v296_v6, 5  ;;  %2924 = vmatpush3.bf16.msra.mxu0 %v3850_v34 }
  0x31   : > { %v351_v32 = vrot.slane %v4043_v11, 1  ;;  %v303_v33 = vunpack.c.l.bf16 %v302_v25  ;;  %v4134_v35 = vpack.i.bf16 %v1023_v28, %v1021_v27  ;;  %v1320_v36 = vsel %vm1313_vm4, %v1317_v21, %v1319_v22  ;;  %3061 = vmatprep.subr.msk.bf16.mxu0 %vm1496_vm5, %v4152_v50 }
  0x32   : > { %3165 = vrot.lane.b32.xlu1 %v3164_v1, %s3935_s9  ;;  %3160 = vrot.lane.b32.xlu0 %v3159_v7, %s3935_s9  ;;  %v1322_v38 = vsel %vm1313_vm4, %v1319_v22, %v1321_v23  ;;  %v353_v39 = vrot.slane %v4045_v12, 1  ;;  %v3179_v40 = vpack.i.bf16 %v1019_v14, %v1197_v30  ;;  %v1318_v42 = vsel %vm1313_vm4, %v1315_v29, %v1317_v21  ;;  %v4203_v30 = vld [vmem:[%s4024_s30 + $0x30] sm:$0xff]  }
  0x33   : > { %v1316_v43 = vsel %vm1313_vm4, %v1314_v31, %v1315_v29  ;;  %v1497_v44 = vrot.slane %v303_v33, 6  ;;  %v1498_v45 = vrot.slane %v4043_v11, 6  ;;  %v1500_v47 = vrot.slane %v4045_v12, 6 }
  0x34   : > { %v3194_v48 = vpack.i.bf16 %v1322_v38, %v1320_v36  ;;  %v352_v49 = vsel %vm341_vm1, %v349_v24, %v351_v32  ;;  %v354_v51 = vsel %vm341_vm1, %v351_v32, %v353_v39  ;;  %v355_v52 = vrot.slane %v4100_v62, 1 }
  0x35   : > { %v357_v53 = vrot.slane %v4105_v2, 1  ;;  %v1502_v24 = vrot.slane %v4100_v62, 6  ;;  %v3189_v54 = vpack.i.bf16 %v1318_v42, %v1316_v43  ;;  %v1504_v55 = vrot.slane %v4105_v2, 6 }
  0x36   : > { %3175 = vrot.lane.b32.xlu1 %v3174_v20, %s3936_s18  ;;  %3170 = vrot.lane.b32.xlu0 %v3169_v26, %s3936_s18  ;;  %v1499_v56 = vsel %vm1496_vm5, %v1497_v44, %v1498_v45  ;;  %v1501_v58 = vsel %vm1496_vm5, %v1498_v45, %v1500_v47  ;;  %v3204_v60 = vpack.i.bf16 %v354_v51, %v352_v49  ;;  %v538_v61 = vrot.slane %v4100_v62, 2 }
  0x37   : > { %v356_v63 = vsel %vm341_vm1, %v353_v39, %v355_v52  ;;  %v358_v1 = vsel %vm341_vm1, %v355_v52, %v357_v53  ;;  %v1503_v6 = vsel %vm1496_vm5, %v1500_v47, %v1502_v24  ;;  %v540_v7 = vrot.slane %v4105_v2, 2 }
  0x38   : > { %v3199_v13 = vpack.i.bf16 %v1501_v58, %v1499_v56  ;;  %v1505_v14 = vsel %vm1496_vm5, %v1502_v24, %v1504_v55  ;;  %v4180_v8 = vunpack.c.h.bf16 %v4095_v57  ;;  %v4182_v15 = vunpack.c.l.bf16 %v2805_v59 }
  0x39   : > { %v3214_v16 = vpack.i.bf16 %v358_v1, %v356_v63  ;;  %v3209_v18 = vpack.i.bf16 %v1505_v14, %v1503_v6  ;;  %v539_v19 = vsel %vm524_vm0, %v536_v37, %v538_v61  ;;  %v541_v20 = vsel %vm524_vm0, %v538_v61, %v540_v7 }
  0x3a   : > { %3185 = vrot.lane.b32.xlu1 %v4134_v35, %s3937_s23  ;;  %3180 = vrot.lane.b32.xlu0 %v3179_v40, %s3937_s23  ;;  %v542_v21 = vrot.slane %v4180_v8, 2  ;;  %v544_v57 = vrot.slane %v4182_v15, 2  ;;  %v3224_v22 = vpack.i.bf16 %v541_v20, %v539_v19  ;;  %v839_v25 = vrot.slane %v4105_v2, 3 }
  0x3b   : > { %v841_v26 = vrot.slane %v4180_v8, 3  ;;  %v837_v27 = vrot.slane %v4100_v62, 3  ;;  %v843_v29 = vrot.slane %v4182_v15, 3  ;;  %v1024_v31 = vrot.slane %v4180_v8, 4 }
  0x3c   : > { %v543_v28 = vsel %vm524_vm0, %v540_v7, %v542_v21  ;;  %v545_v37 = vsel %vm524_vm0, %v542_v21, %v544_v57  ;;  %v1026_v36 = vrot.slane %v4182_v15, 4  ;;  %v4220_v40 = vunpack.c.h.bf16 %v2805_v59 }
  0x3d   : > { %v4207_v32 = vpack.i.bf16 %v545_v37, %v543_v28  ;;  %v842_v33 = vsel %vm827_vm2, %v839_v25, %v841_v26  ;;  %v838_v34 = vsel %vm827_vm2, %v835_v41, %v837_v27  ;;  %v844_v38 = vsel %vm827_vm2, %v841_v26, %v843_v29 }
  0x3e   : > { %3195 = vrot.lane.b32.xlu1 %v3194_v48, %s3938_s26  ;;  %3190 = vrot.lane.b32.xlu0 %v3189_v54, %s3938_s26  ;;  %v840_v39 = vsel %vm827_vm2, %v837_v27, %v839_v25  ;;  %v4223_v42 = vunpack.c.l.bf16 %v4203_v30  ;;  %v3244_v41 = vpack.i.bf16 %v844_v38, %v842_v33  ;;  %v1027_v44 = vsel %vm1010_vm3, %v1024_v31, %v1026_v36 }
  0x3f   : > { %v3239_v43 = vpack.i.bf16 %v840_v39, %v838_v34  ;;  %v1028_v45 = vrot.slane %v4220_v40, 4  ;;  %v1325_v49 = vrot.slane %v4182_v15, 5  ;;  %v1323_v51 = vrot.slane %v4180_v8, 5 }
  0x40   : > { %6446 = vst [vmem:[#allocation5_spill] sm:$0xff] %v4223_v42  ;;  %v1030_v47 = vrot.slane %v4223_v42, 4  ;;  %v1327_v24 = vrot.slane %v4220_v40, 5  ;;  %v1329_v54 = vrot.slane %v4223_v42, 5  ;;  %v359_v56 = vrot.slane %v4180_v8, 1 }
  0x41   : > { %v1029_v52 = vsel %vm1010_vm3, %v1026_v36, %v1028_v45  ;;  %v1324_v59 = vsel %vm1313_vm4, %v1321_v23, %v1323_v51  ;;  %v361_v61 = vrot.slane %v4182_v15, 1  ;;  %v1506_v6 = vrot.slane %v4180_v8, 6 }
  0x42   : > { %3205 = vrot.lane.b32.xlu1 %v3204_v60, %s3933_s5  ;;  %3200 = vrot.lane.b32.xlu0 %v3199_v13, %s3939_s27  ;;  %v1326_v60 = vsel %vm1313_vm4, %v1323_v51, %v1325_v49  ;;  %v1328_v63 = vsel %vm1313_vm4, %v1325_v49, %v1327_v24  ;;  %v1330_v1 = vsel %vm1313_vm4, %v1327_v24, %v1329_v54  ;;  %v1508_v7 = vrot.slane %v4182_v15, 6 }
  0x43   : > { %v3269_v13 = vpack.i.bf16 %v1326_v60, %v1324_v59  ;;  %v360_v23 = vsel %vm341_vm1, %v357_v53, %v359_v56  ;;  %v362_v14 = vsel %vm341_vm1, %v359_v56, %v361_v61  ;;  %v1507_v19 = vsel %vm1496_vm5, %v1504_v55, %v1506_v6 }
  0x44   : > { %v1509_v20 = vsel %vm1496_vm5, %v1506_v6, %v1508_v7  ;;  %v1510_v53 = vrot.slane %v4220_v40, 6  ;;  %v1512_v21 = vrot.slane %v4223_v42, 6  ;;  %v3284_v25 = vpack.i.bf16 %v362_v14, %v360_v23 }
  0x45   : > { %v546_v26 = vrot.slane %v4220_v40, 2  ;;  %v3279_v27 = vpack.i.bf16 %v1509_v20, %v1507_v19  ;;  %v548_v55 = vrot.slane %v4223_v42, 2  ;;  %v4290_v34 = vunpack.c.h.bf16 %v4203_v30 }
  0x46   : > { %3215 = vrot.lane.b32.xlu1 %v3214_v16, %s3933_s5  ;;  %3210 = vrot.lane.b32.xlu0 %v3209_v18, %s3939_s27  ;;  %v363_v16 = vrot.slane %v4220_v40, 1  ;;  %v365_v18 = vrot.slane %v4223_v42, 1  ;;  %v1513_v33 = vsel %vm1496_vm5, %v1510_v53, %v1512_v21  ;;  %v845_v49 = vrot.slane %v4220_v40, 3 }
  0x47   : > { %6447 = vst [vmem:[#allocation6_spill] sm:$0xff] %v4290_v34  ;;  %v1032_v24 = vrot.slane %v4290_v34, 4 }
  0x48   : > { %v364_v28 = vsel %vm341_vm1, %v361_v61, %v363_v16  ;;  %v366_v37 = vsel %vm341_vm1, %v363_v16, %v365_v18  ;;  %v846_v60 = vsel %vm827_vm2, %v843_v29, %v845_v49 }
  0x49   : > { %v3294_v38 = vpack.i.bf16 %v366_v37, %v364_v28  ;;  %v367_v28 = vrot.slane %v4290_v34, 1  ;;  %v2068_v37 = vsel %vm1496_vm5, %v4152_v50, 0 }
  0x4a   : > { %3225 = vrot.lane.b32.xlu1 %v3224_v22, %s3932_s4  ;;  %3220 = vrot.lane.b32.xlu0 %v4081_v46, %s3932_s4  ;;  %v1025_v46 = vsel %vm1010_vm3, %v1022_v17, %v1024_v31  ;;  %v1031_v17 = vsel %vm1010_vm3, %v1028_v45, %v1030_v47  ;;  %v1511_v31 = vsel %vm1496_vm5, %v1508_v7, %v1510_v53  ;;  %v847_v45 = vrot.slane %v4223_v42, 3 }
  0x4b   : > { %v3254_v48 = vpack.i.bf16 %v1027_v44, %v1025_v46  ;;  %v4246_v58 = vpack.i.bf16 %v1031_v17, %v1029_v52  ;;  %v3289_v39 = vpack.i.bf16 %v1513_v33, %v1511_v31  ;;  %v550_v46 = vrot.slane %v4290_v34, 2  ;;  %v2808_v17 = vld [vmem:[%s4024_s30 + $0x40] sm:$0xff]   ;;  %2926 = vmatpush3.bf16.msra.mxu0 %v2068_v37 }
  0x4c   : > { %v4330_v7 = vunpack.c.l.bf16 %v2808_v17 }
  0x4d   : > { %v551_v51 = vsel %vm524_vm0, %v548_v55, %v550_v46 }
  0x4e   : > { %3235 = vrot.lane.b32.xlu1 %v4207_v32, %s3934_s6  ;;  %3230 = vrot.lane.b32.xlu0 %v3224_v22, %s3934_s6  ;;  %v2807_v22 = vld [vmem:[%s4024_s30 + $0x38] sm:$0xff]   ;;  %6449 = vst [vmem:[#allocation8_spill] sm:$0xff] %v4330_v7  ;;  %v1038_v14 = vrot.slane %v4330_v7, 4 }
  0x4f   : > { %v4292_v36 = vunpack.c.l.bf16 %v2807_v22  ;;  %v4328_v6 = vunpack.c.h.bf16 %v2807_v22  ;;  %v1337_v22 = vrot.slane %v4330_v7, 5 }
  0x51   : > { %6448 = vst [vmem:[#allocation7_spill] sm:$0xff] %v4292_v36  ;;  %v552_v30 = vrot.slane %v4292_v36, 2  ;;  %v851_v52 = vrot.slane %v4292_v36, 3  ;;  %v1034_v61 = vrot.slane %v4292_v36, 4  ;;  %v1333_v19 = vrot.slane %v4292_v36, 5 }
  0x52   : > { %3245 = vrot.lane.b32.xlu1 %v3244_v41, %s3935_s9  ;;  %3240 = vrot.lane.b32.xlu0 %v3239_v43, %s3935_s9  ;;  %v547_v41 = vsel %vm524_vm0, %v544_v57, %v546_v26  ;;  %v549_v43 = vsel %vm524_vm0, %v546_v26, %v548_v55  ;;  %v1335_v20 = vrot.slane %v4328_v6, 5  ;;  %v1516_v50 = vrot.slane %v4292_v36, 6 }
  0x53   : > { %v3304_v44 = vpack.i.bf16 %v549_v43, %v547_v41  ;;  %v553_v57 = vsel %vm524_vm0, %v550_v46, %v552_v30  ;;  %v1035_v23 = vsel %vm1010_vm3, %v1032_v24, %v1034_v61  ;;  %v371_v46 = vrot.slane %v4328_v6, 1 }
  0x54   : > { %v4315_v56 = vpack.i.bf16 %v553_v57, %v551_v51  ;;  %v1338_v55 = vsel %vm1313_vm4, %v1335_v20, %v1337_v22  ;;  %v1518_v51 = vrot.slane %v4328_v6, 6  ;;  %v1520_v57 = vrot.slane %v4330_v7, 6 }
  0x56   : > { %3255 = vrot.lane.b32.xlu1 %v3254_v48, %s3936_s18  ;;  %3250 = vrot.lane.b32.xlu0 %v4134_v35, %s3936_s18  ;;  %v3274_v35 = vpack.i.bf16 %v1330_v1, %v1328_v63  ;;  %v848_v1 = vsel %vm827_vm2, %v845_v49, %v847_v45 }
  0x57   : > { %v3319_v29 = vpack.i.bf16 %v848_v1, %v846_v60  ;;  %v556_v1 = vrot.slane %v4330_v7, 2 }
  0x5a   : > { %3265 = vrot.lane.b32.xlu1 %v4246_v58, %s3937_s23  ;;  %3260 = vrot.lane.b32.xlu0 %v3254_v48, %s3937_s23  ;;  %v849_v48 = vrot.slane %v4290_v34, 3 }
  0x5c   : > { %v850_v59 = vsel %vm827_vm2, %v847_v45, %v849_v48  ;;  %v852_v63 = vsel %vm827_vm2, %v849_v48, %v851_v52  ;;  %v2809_v45 = vld [vmem:[%s4024_s30 + $0x48] sm:$0xff]  }
  0x5d   : > { %v4390_v60 = vunpack.c.l.bf16 %v2809_v45 }
  0x5e   : > { %3275 = vrot.lane.b32.xlu1 %v3274_v35, %s3938_s26  ;;  %3270 = vrot.lane.b32.xlu0 %v3269_v13, %s3938_s26  ;;  %v3324_v13 = vpack.i.bf16 %v852_v63, %v850_v59  ;;  %v1036_v35 = vrot.slane %v4328_v6, 4  ;;  %v4388_v59 = vunpack.c.h.bf16 %v2808_v17  ;;  %v1521_v17 = vsel %vm1496_vm5, %v1518_v51, %v1520_v57 }
  0x5f   : > { %6451 = vst [vmem:[#allocation10_spill] sm:$0xff] %v4390_v60 }
  0x60   : > { %v1037_v53 = vsel %vm1010_vm3, %v1034_v61, %v1036_v35  ;;  %6450 = vst [vmem:[#allocation9_spill] sm:$0xff] %v4388_v59 }
  0x62   : > { %3285 = vrot.lane.b32.xlu1 %v3284_v25, %s3933_s5  ;;  %3280 = vrot.lane.b32.xlu0 %v3279_v27, %s3939_s27  ;;  %v1331_v25 = vrot.slane %v4290_v34, 5  ;;  %v1336_v27 = vsel %vm1313_vm4, %v1333_v19, %v1335_v20  ;;  %v855_v20 = vrot.slane %v4330_v7, 3 }
  0x64   : > { %v1332_v31 = vsel %vm1313_vm4, %v1329_v54, %v1331_v25  ;;  %v1334_v33 = vsel %vm1313_vm4, %v1331_v25, %v1333_v19  ;;  %v368_v54 = vsel %vm341_vm1, %v365_v18, %v367_v28  ;;  %v859_v25 = vrot.slane %v4390_v60, 3 }
  0x65   : > { %v3349_v41 = vpack.i.bf16 %v1334_v33, %v1332_v31 }
  0x66   : > { %3295 = vrot.lane.b32.xlu1 %v3294_v38, %s3933_s5  ;;  %3290 = vrot.lane.b32.xlu0 %v3289_v39, %s3939_s27  ;;  %v369_v38 = vrot.slane %v4292_v36, 1  ;;  %v1514_v39 = vrot.slane %v4290_v34, 6 }
  0x68   : > { %v370_v43 = vsel %vm341_vm1, %v367_v28, %v369_v38  ;;  %v1515_v48 = vsel %vm1496_vm5, %v1512_v21, %v1514_v39  ;;  %v1517_v49 = vsel %vm1496_vm5, %v1514_v39, %v1516_v50  ;;  %v372_v21 = vsel %vm341_vm1, %v369_v38, %v371_v46 }
  0x69   : > { %v3364_v18 = vpack.i.bf16 %v370_v43, %v368_v54  ;;  %v3359_v61 = vpack.i.bf16 %v1517_v49, %v1515_v48  ;;  %v1040_v38 = vrot.slane %v4388_v59, 4  ;;  %v1042_v39 = vrot.slane %v4390_v60, 4 }
  0x6a   : > { %3305 = vrot.lane.b32.xlu1 %v3304_v44, %s3932_s4  ;;  %3300 = vrot.lane.b32.xlu0 %v4207_v32, %s3932_s4  ;;  %v1033_v32 = vsel %vm1010_vm3, %v1030_v47, %v1032_v24  ;;  %v1039_v47 = vsel %vm1010_vm3, %v1036_v35, %v1038_v14  ;;  %v554_v24 = vrot.slane %v4328_v6, 2  ;;  %v1339_v48 = vrot.slane %v4388_v59, 5 }
  0x6b   : > { %v3334_v16 = vpack.i.bf16 %v1035_v23, %v1033_v32  ;;  %v4352_v26 = vpack.i.bf16 %v1039_v47, %v1037_v53  ;;  %v558_v32 = vrot.slane %v4388_v59, 2  ;;  %v560_v23 = vrot.slane %v4390_v60, 2  ;;  %v2810_v47 = vld [vmem:[%s4024_s30 + $0x50] sm:$0xff]  }
  0x6c   : > { %v557_v19 = vsel %vm524_vm0, %v554_v24, %v556_v1  ;;  %v857_v53 = vrot.slane %v4388_v59, 3  ;;  %v4423_v31 = vunpack.c.l.bf16 %v2810_v47 }
  0x6d   : > { %v559_v37 = vsel %vm524_vm0, %v556_v1, %v558_v32 }
  0x6e   : > { %3315 = vrot.lane.b32.xlu1 %v4315_v56, %s3934_s6  ;;  %3310 = vrot.lane.b32.xlu0 %v3304_v44, %s3934_s6  ;;  %v373_v44 = vrot.slane %v4330_v7, 1  ;;  %6453 = vst [vmem:[#allocation12_spill] sm:$0xff] %v4423_v31  ;;  %v858_v33 = vsel %vm827_vm2, %v855_v20, %v857_v53  ;;  %v1046_v49 = vrot.slane %v4423_v31, 4 }
  0x70   : > { %v374_v63 = vsel %vm341_vm1, %v371_v46, %v373_v44  ;;  %v1341_v46 = vrot.slane %v4390_v60, 5 }
  0x72   : > { %3325 = vrot.lane.b32.xlu1 %v3324_v13, %s3935_s9  ;;  %3320 = vrot.lane.b32.xlu0 %v3319_v29, %s3935_s9  ;;  %v1519_v13 = vsel %vm1496_vm5, %v1516_v50, %v1518_v51  ;;  %v3374_v29 = vpack.i.bf16 %v374_v63, %v372_v21  ;;  %v6413_v51 = vrot.slane %v4423_v31, 5  ;;  %v1041_v21 = vsel %vm1010_vm3, %v1038_v14, %v1040_v38 }
  0x73   : > { %v3369_v35 = vpack.i.bf16 %v1521_v17, %v1519_v13  ;;  %v4461_v13 = vsel %vm1313_vm4, %v1337_v22, %v1339_v48 }
  0x76   : > { %3335 = vrot.lane.b32.xlu1 %v3334_v16, %s3936_s18  ;;  %3330 = vrot.lane.b32.xlu0 %v4246_v58, %s3936_s18  ;;  %v3354_v58 = vpack.i.bf16 %v1338_v55, %v1336_v27  ;;  %v853_v27 = vrot.slane %v4328_v6, 3  ;;  %v4420_v55 = vunpack.c.h.bf16 %v2809_v45 }
  0x78   : > { %6452 = vst [vmem:[#allocation11_spill] sm:$0xff] %v4420_v55  ;;  %v856_v54 = vsel %vm827_vm2, %v853_v27, %v855_v20  ;;  %v1044_v43 = vrot.slane %v4420_v55, 4  ;;  %v1343_v45 = vrot.slane %v4420_v55, 5  ;;  %v379_v20 = vrot.slane %v4420_v55, 1 }
  0x7a   : > { %3345 = vrot.lane.b32.xlu1 %v4352_v26, %s3937_s23  ;;  %3340 = vrot.lane.b32.xlu0 %v3334_v16, %s3937_s23  ;;  %v555_v16 = vsel %vm524_vm0, %v552_v30, %v554_v24  ;;  %v561_v30 = vsel %vm524_vm0, %v558_v32, %v560_v23  ;;  %v1045_v63 = vsel %vm1010_vm3, %v1042_v39, %v1044_v43  ;;  %v1522_v32 = vrot.slane %v4388_v59, 6 }
  0x7b   : > { %v3384_v28 = vpack.i.bf16 %v557_v19, %v555_v16  ;;  %v4428_v50 = vpack.i.bf16 %v561_v30, %v559_v37  ;;  %v4456_v1 = vsel %vm1313_vm4, %v1341_v46, %v1343_v45  ;;  %v1047_v14 = vsel %vm1010_vm3, %v1044_v43, %v1046_v49 }
  0x7c   : > { %v4470_v17 = vsel %vm1313_vm4, %v1343_v45, %v6413_v51  ;;  %v1524_v19 = vrot.slane %v4390_v60, 6  ;;  %v4492_v37 = vunpack.c.h.bf16 %v2810_v47  ;;  %v562_v43 = vrot.slane %v4420_v55, 2 }
  0x7d   : > { %v3434_v30 = vpack.i.bf16 %v4470_v17, %v4456_v1  ;;  %v863_v45 = vrot.slane %v4423_v31, 3 }
  0x7e   : > { %3355 = vrot.lane.b32.xlu1 %v3354_v58, %s3938_s26  ;;  %3350 = vrot.lane.b32.xlu0 %v3349_v41, %s3938_s26  ;;  %v860_v58 = vsel %vm827_vm2, %v857_v53, %v859_v25  ;;  %v854_v41 = vsel %vm827_vm2, %v851_v52, %v853_v27  ;;  %v375_v52 = vrot.slane %v4388_v59, 1  ;;  %v4488_v27 = vpack.i.bf16 %v1047_v14, %v1045_v63  ;;  %v4702_v59 = vld [vmem:[%s4024_s30 + $0x68] sm:$0xff]  }
  0x7f   : > { %v3404_v24 = vpack.i.bf16 %v860_v58, %v858_v33  ;;  %6454 = vst [vmem:[#allocation13_spill] sm:$0xff] %v4492_v37  ;;  %v4508_v47 = vsel %vm1496_vm5, %v1522_v32, %v1524_v19  ;;  %v1048_v63 = vrot.slane %v4492_v37, 4 }
  0x80   : > { %v4480_v22 = vsel %vm341_vm1, %v373_v44, %v375_v52 }
  0x82   : > { %3365 = vrot.lane.b32.xlu1 %v3364_v18, %s3933_s5  ;;  %3360 = vrot.lane.b32.xlu0 %v3359_v61, %s3939_s27  ;;  %v377_v18 = vrot.slane %v4390_v60, 1  ;;  %v3399_v61 = vpack.i.bf16 %v856_v54, %v854_v41  ;;  %v1526_v41 = vrot.slane %v4420_v55, 6  ;;  %v6411_v54 = vrot.slane %v4423_v31, 6 }
  0x83   : > { %v4726_v60 = vunpack.c.l.bf16 %v4702_v59 }
  0x84   : > { %v4483_v16 = vsel %vm341_vm1, %v375_v52, %v377_v18  ;;  %v4511_v58 = vsel %vm341_vm1, %v377_v18, %v379_v20  ;;  %v566_v52 = vrot.slane %v4492_v37, 2  ;;  %v4541_v14 = vsel %vm1496_vm5, %v1524_v19, %v1526_v41 }
  0x85   : > { %v3444_v33 = vpack.i.bf16 %v4483_v16, %v4480_v22 }
  0x86   : > { %3375 = vrot.lane.b32.xlu1 %v3374_v29, %s3933_s5  ;;  %3370 = vrot.lane.b32.xlu0 %v3369_v35, %s3939_s27  ;;  %v4473_v29 = vsel %vm1313_vm4, %v1339_v48, %v1341_v46  ;;  %v2811_v35 = vld [vmem:[%s4024_s30 + $0x58] sm:$0xff]   ;;  %v564_v46 = vrot.slane %v4423_v31, 2  ;;  %v4520_v48 = vld [vmem:[%s4024_s30 + $0x60] sm:$0xff]  }
  0x87   : > { %v4494_v44 = vunpack.c.l.bf16 %v2811_v35  ;;  %v4548_v17 = vunpack.c.h.bf16 %v2811_v35 }
  0x88   : > { %v567_v35 = vsel %vm524_vm0, %v564_v46, %v566_v52 }
  0x89   : > { %6455 = vst [vmem:[#allocation14_spill] sm:$0xff] %v4494_v44  ;;  %v6410_v18 = vrot.slane %v4494_v44, 2  ;;  %v1050_v1 = vrot.slane %v4494_v44, 4 }
  0x8a   : > { %3385 = vrot.lane.b32.xlu1 %v3384_v28, %s3932_s4  ;;  %3380 = vrot.lane.b32.xlu0 %v4315_v56, %s3932_s4  ;;  %v1043_v56 = vsel %vm1010_vm3, %v1040_v38, %v1042_v39  ;;  %v4504_v38 = vsel %vm1496_vm5, %v1520_v57, %v1522_v32  ;;  %v6412_v39 = vrot.slane %v4423_v31, 1  ;;  %v861_v57 = vrot.slane %v4420_v55, 3 }
  0x8b   : > { %v3414_v53 = vpack.i.bf16 %v1043_v56, %v1041_v21  ;;  %v3439_v21 = vpack.i.bf16 %v4508_v47, %v4504_v38  ;;  %v565_v38 = vsel %vm524_vm0, %v562_v43, %v564_v46 }
  0x8c   : > { %v4534_v56 = vsel %vm341_vm1, %v379_v20, %v6412_v39  ;;  %v563_v20 = vsel %vm524_vm0, %v560_v23, %v562_v43  ;;  %v4562_v19 = vsel %vm827_vm2, %v859_v25, %v861_v57  ;;  %v4565_v47 = vsel %vm827_vm2, %v861_v57, %v863_v45 }
  0x8d   : > { %v3454_v43 = vpack.i.bf16 %v4534_v56, %v4511_v58  ;;  %v1049_v57 = vsel %vm1010_vm3, %v1046_v49, %v1048_v63  ;;  %v4592_v9 = vpack.i.bf16 %v565_v38, %v563_v20  ;;  %v1347_v38 = vrot.slane %v4492_v37, 5 }
  0x8e   : > { %3395 = vrot.lane.b32.xlu1 %v4428_v50, %s3934_s6  ;;  %3390 = vrot.lane.b32.xlu0 %v3384_v28, %s3934_s6  ;;  %v3429_v28 = vpack.i.bf16 %v4473_v29, %v4461_v13  ;;  %v4551_v29 = vunpack.c.l.bf16 %v4520_v48  ;;  %v1534_v39 = vrot.slane %v4548_v17, 6 }
  0x90   : > { %6456 = vst [vmem:[#allocation15_spill] sm:$0xff] %v4551_v29 }
  0x92   : > { %3405 = vrot.lane.b32.xlu1 %v3404_v24, %s3935_s9  ;;  %3400 = vrot.lane.b32.xlu0 %v3399_v61, %s3935_s9  ;;  %v865_v24 = vrot.slane %v4492_v37, 3  ;;  %v6409_v61 = vrot.slane %v4494_v44, 3 }
  0x94   : > { %v4574_v23 = vsel %vm827_vm2, %v863_v45, %v865_v24  ;;  %v4579_v25 = vsel %vm827_vm2, %v865_v24, %v6409_v61  ;;  %v1051_v45 = vsel %vm1010_vm3, %v1048_v63, %v1050_v1  ;;  %v1052_v24 = vrot.slane %v4548_v17, 4 }
  0x95   : > { %v4605_v63 = vpack.i.bf16 %v1051_v45, %v1049_v57  ;;  %v1530_v45 = vrot.slane %v4492_v37, 6 }
  0x96   : > { %3415 = vrot.lane.b32.xlu1 %v3414_v53, %s3936_s18  ;;  %3410 = vrot.lane.b32.xlu0 %v4352_v26, %s3936_s18  ;;  %v4546_v26 = vsel %vm1496_vm5, %v1526_v41, %v6411_v54  ;;  %v569_v41 = vsel %vm524_vm0, %v566_v52, %v6410_v18  ;;  %v387_v18 = vrot.slane %v4548_v17, 1  ;;  %v6457_v54 = vrot.slane %v4551_v29, 5 }
  0x97   : > { %v3449_v46 = vpack.i.bf16 %v4546_v26, %v4541_v14  ;;  %v4598_v58 = vpack.i.bf16 %v569_v41, %v567_v35  ;;  %v1349_v14 = vrot.slane %v4494_v44, 5  ;;  %v1351_v26 = vrot.slane %v4548_v17, 5 }
  0x98   : > { %v4538_v13 = vpop.permute.xlu1 %3140  ;;  %v4553_v32 = vpop.permute.xlu0 %3130  ;;  %v383_v35 = vrot.slane %v4492_v37, 1  ;;  %v385_v41 = vrot.slane %v4494_v44, 1  ;;  %v6458_v37 = vrot.slane %v4423_v31, 5 }
  0x99   : > { %v4643_v51 = vsel %vm1313_vm4, %v1351_v26, %v6457_v54  ;;  %v4651_v16 = vsel %vm1313_vm4, %v1347_v38, %v1349_v14  ;;  %v3142_v55 = vunpack.i.l.bf16 %v4538_v13 }
  0x9a   : > { %3425 = vrot.lane.b32.xlu1 %v4488_v27, %s3937_s23  ;;  %3420 = vrot.lane.b32.xlu0 %v3414_v53, %s3937_s23  ;;  %v6414_v53 = vrot.slane %v4551_v29, 4  ;;  %v4648_v22 = vsel %vm1313_vm4, %v6458_v37, %v1347_v38  ;;  %v4661_v54 = vsel %vm341_vm1, %v383_v35, %v385_v41 }
  0x9c   : > { %v4590_v52 = vpop.permute.xlu1 %3145  ;;  %v4596_v61 = vpop.permute.xlu0 %3135  ;;  %v1055_v57 = vsel %vm1010_vm3, %v1052_v24, %v6414_v53  ;;  %v6461_v53 = vrot.slane %v4551_v29, 1 }
  0x9d   : > { %v3147_v34 = vunpack.i.l.bf16 %v4590_v52 }
  0x9e   : > { %3435 = vrot.lane.b32.xlu1 %v3434_v30, %s3938_s26  ;;  %3430 = vrot.lane.b32.xlu0 %v3429_v28, %s3938_s26  ;;  %v1053_v30 = vsel %vm1010_vm3, %v1050_v1, %v1052_v24  ;;  %v1532_v28 = vrot.slane %v4494_v44, 6  ;;  %v4633_v1 = vsel %vm1313_vm4, %v1349_v14, %v1351_v26  ;;  %v570_v24 = vrot.slane %v4548_v17, 2 }
  0x9f   : > { %v4638_v20 = vpack.i.bf16 %v1055_v57, %v1053_v30  ;;  %v6460_v26 = vrot.slane %v4423_v31, 6  ;;  %v4674_v57 = vsel %vm341_vm1, %v385_v41, %v387_v18  ;;  %v3137_v41 = vunpack.i.l.bf16 %v4596_v61 }
  0xa0   : > { %v4614_v56 = vpop.permute.xlu1 %3155  ;;  %v4622_v49 = vpop.permute.xlu0 %3150  ;;  %v4669_v14 = vsel %vm1496_vm5, %v1530_v45, %v1532_v28 }
  0xa1   : > { %v4666_v37 = vsel %vm1496_vm5, %v6460_v26, %v1530_v45  ;;  %v6463_v45 = vrot.slane %v4494_v44, 2 }
  0xa2   : > { %3445 = vrot.lane.b32.xlu1 %v3444_v33, %s3933_s5  ;;  %3440 = vrot.lane.b32.xlu0 %v3439_v21, %s3939_s27  ;;  %v6459_v21 = vrot.slane %v4423_v31, 1  ;;  %v6462_v31 = vrot.slane %v4551_v29, 6 }
  0xa3   : > { %v571_v7 = vsel %vm524_vm0, %v6463_v45, %v570_v24  ;;  %v3133_v45 = vunpack.i.h.bf16 %v4553_v32 }
  0xa4   : > { %v4653_v33 = vpop.permute.xlu1 %3165  ;;  %v4658_v30 = vsel %vm341_vm1, %v6459_v21, %v383_v35  ;;  %v4671_v38 = vpop.permute.xlu0 %3160  ;;  %v4679_v21 = vsel %vm341_vm1, %v387_v18, %v6461_v53  ;;  %v4682_v35 = vsel %vm1496_vm5, %v1532_v28, %v1534_v39  ;;  %v4687_v26 = vsel %vm1496_vm5, %v1534_v39, %v6462_v31 }
  0xa5   : > { %v6464_v18 = vrot.slane %v4551_v29, 2  ;;  %v4699_v28 = vunpack.c.h.bf16 %v4520_v48  ;;  %v3138_v31 = vunpack.i.h.bf16 %v4596_v61  ;;  %v3143_v61 = vunpack.i.h.bf16 %v4538_v13 }
  0xa6   : > { %3455 = vrot.lane.b32.xlu1 %v3454_v43, %s3933_s5  ;;  %3450 = vrot.lane.b32.xlu0 %v3449_v46, %s3939_s27  ;;  %v1680_v42 = vsel %vm1678_vm6, %v4032_v3, %v3133_v45  ;;  %v3148_v48 = vunpack.i.h.bf16 %v4590_v52  ;;  %v3157_v3 = vunpack.i.l.bf16 %v4614_v56  ;;  %v3153_v45 = vunpack.i.h.bf16 %v4622_v49 }
  0xa7   : > { %v573_v53 = vsel %vm524_vm0, %v570_v24, %v6464_v18  ;;  %6465 = vst [vmem:[#allocation16_spill] sm:$0xff] %v4699_v28  ;;  %v3132_v24 = vunpack.i.l.bf16 %v4553_v32  ;;  %v6466_v32 = vunpack.c.l.bf16 %v4027_v0  ;;  %v6470_v52 = vrot.slane %v4494_v44, 3 }
  0xa8   : > { %v4713_v18 = vpop.permute.xlu1 %3175  ;;  %v4721_v39 = vpop.permute.xlu0 %3170  ;;  %v4723_v43 = vpack.i.bf16 %v573_v53, %v571_v7  ;;  %v1681_v53 = vsel %vm1678_vm6, %v4034_v4, %v3137_v41  ;;  %v3158_v7 = vunpack.i.h.bf16 %v4614_v56  ;;  %v1717_v4 = vsel %vm1715_vm7, %v1680_v42, %v3143_v61 }
  0xa9   : > { %v1679_v46 = vsel %vm1678_vm6, %v6466_v32, %v3132_v24  ;;  %v3152_v24 = vunpack.i.l.bf16 %v4622_v49  ;;  %v6467_v56 = vrot.slane %v4699_v28, 2  ;;  %v6468_v41 = vrot.slane %v4551_v29, 2 }
  0xaa   : > { %3465 = vrot.lane.b32.xlu1 %v4592_v9, %s3932_s4  ;;  %3460 = vrot.lane.b32.xlu0 %v4428_v50, %s3932_s4  ;;  %v1682_v50 = vsel %vm1678_vm6, %v4036_v5, %v3138_v31  ;;  %v1716_v31 = vsel %vm1715_vm7, %v1679_v46, %v3142_v55  ;;  %v6469_v32 = vrot.slane %v4548_v17, 3  ;;  %v1718_v55 = vsel %vm1715_vm7, %v1681_v53, %v3147_v34 }
  0xab   : > { %v4769_v49 = vsel %vm524_vm0, %v6468_v41, %v6467_v56  ;;  %v1719_v42 = vsel %vm1715_vm7, %v1682_v50, %v3148_v48  ;;  %v3162_v46 = vunpack.i.l.bf16 %v4671_v38  ;;  %v1755_v56 = vsel %vm1752_vm8, %v1718_v55, %v3157_v3 }
  0xac   : > { %v4746_v13 = vpop.permute.xlu1 %3185  ;;  %v3181_v0 = vpop.permute.xlu0 %3180  ;;  %v4776_v5 = vsel %vm827_vm2, %v6470_v52, %v6469_v32  ;;  %v1756_v41 = vsel %vm1752_vm8, %v1719_v42, %v3158_v7  ;;  %v3173_v36 = vunpack.i.h.bf16 %v4721_v39  ;;  %v3172_v44 = vunpack.i.l.bf16 %v4721_v39 }
  0xad   : > { %v1753_v32 = vsel %vm1752_vm8, %v1716_v31, %v3152_v24  ;;  %v1754_v34 = vsel %vm1752_vm8, %v1717_v4, %v3153_v45  ;;  %v3183_v48 = vunpack.i.h.bf16 %v3181_v0  ;;  %v3182_v53 = vunpack.i.l.bf16 %v3181_v0 }
  0xae   : > { %3475 = vrot.lane.b32.xlu1 %v4598_v58, %s3934_s6  ;;  %3470 = vrot.lane.b32.xlu0 %v4592_v9, %s3934_s6  ;;  %v3163_v9 = vunpack.i.h.bf16 %v4671_v38  ;;  %v6471_v38 = vpack.i.bf16 %v4579_v25, %v4574_v23  ;;  %v3168_v50 = vunpack.i.h.bf16 %v4653_v33  ;;  %v3167_v7 = vunpack.i.l.bf16 %v4653_v33 }
  0xaf   : > { %v6472_v39 = vpack.i.bf16 %v4565_v47, %v4562_v19  ;;  %v1790_v45 = vsel %vm1789_vm9, %v1753_v32, %v3162_v46  ;;  %v3178_v24 = vunpack.i.h.bf16 %v4713_v18  ;;  %v3177_v23 = vunpack.i.l.bf16 %v4713_v18 }
  0xb0   : > { %v3196_v61 = vpop.permute.xlu1 %3195  ;;  %v3191_v52 = vpop.permute.xlu0 %3190  ;;  %v1791_v0 = vsel %vm1789_vm9, %v1754_v34, %v3163_v9  ;;  %v1827_v31 = vsel %vm1826_vm10, %v1790_v45, %v3172_v44  ;;  %v3188_v4 = vunpack.i.h.bf16 %v4746_v13  ;;  %v3187_v42 = vunpack.i.l.bf16 %v4746_v13 }
  0xb1   : > { %v3193_v3 = vunpack.i.h.bf16 %v3191_v52  ;;  %v3192_v55 = vunpack.i.l.bf16 %v3191_v52  ;;  %v1828_v33 = vsel %vm1826_vm10, %v1791_v0, %v3173_v36  ;;  %v1864_v9 = vsel %vm1863_vm11, %v1827_v31, %v3182_v53 }
  0xb2   : > { %3485 = vrot.lane.b32.xlu1 %v6471_v38, %s3935_s9  ;;  %3480 = vrot.lane.b32.xlu0 %v6472_v39, %s3935_s9  ;;  %v1865_v18 = vsel %vm1863_vm11, %v1828_v33, %v3183_v48  ;;  %v3198_v46 = vunpack.i.h.bf16 %v3196_v61  ;;  %v3197_v32 = vunpack.i.l.bf16 %v3196_v61  ;;  %v1792_v13 = vsel %vm1789_vm9, %v1755_v56, %v3167_v7 }
  0xb3   : > { %v1901_v36 = vsel %vm1900_vm12, %v1864_v9, %v3192_v55  ;;  %v1902_v44 = vsel %vm1900_vm12, %v1865_v18, %v3193_v3  ;;  %v1793_v34 = vsel %vm1789_vm9, %v1756_v41, %v3168_v50  ;;  %v1829_v39 = vsel %vm1826_vm10, %v1792_v13, %v3177_v23  ;;  %v4832_v41 = vld [vmem:[%s4024_s30 + $0x70] sm:$0xff]  }
  0xb4   : > { %v4802_v25 = vpop.permute.xlu1 %3205  ;;  %v3201_v19 = vpop.permute.xlu0 %3200  ;;  %v1830_v61 = vsel %vm1826_vm10, %v1793_v34, %v3178_v24  ;;  %v6473_v55 = vrot.slane %v4551_v29, 3  ;;  %v6474_v3 = vrot.slane %v4548_v17, 3  ;;  %v1866_v50 = vsel %vm1863_vm11, %v1829_v39, %v3187_v42 }
  0xb5   : > { %v3203_v47 = vunpack.i.h.bf16 %v3201_v19  ;;  %v3202_v52 = vunpack.i.l.bf16 %v3201_v19  ;;  %v1867_v7 = vsel %vm1863_vm11, %v1830_v61, %v3188_v4  ;;  %v1903_v24 = vsel %vm1900_vm12, %v1866_v50, %v3197_v32 }
  0xb6   : > { %3495 = vrot.lane.b32.xlu1 %v4605_v63, %s3936_s18  ;;  %3490 = vrot.lane.b32.xlu0 %v4488_v27, %s3936_s18  ;;  %v4829_v56 = vsel %vm827_vm2, %v6474_v3, %v6473_v55  ;;  %v1904_v23 = vsel %vm1900_vm12, %v1867_v7, %v3198_v46  ;;  %v6475_v33 = vrot.slane %v4726_v60, 2  ;;  %v6476_v42 = vrot.slane %v4699_v28, 2 }
  0xb7   : > { %v1938_v53 = vsel %vm1937_vm13, %v1901_v36, %v3202_v52  ;;  %v1939_v48 = vsel %vm1937_vm13, %v1902_v44, %v3203_v47  ;;  %v4853_v9 = vunpack.c.h.bf16 %v4702_v59  ;;  %v4856_v18 = vunpack.c.l.bf16 %v4832_v41 }
  0xb8   : > { %v4818_v38 = vpop.permute.xlu1 %3215  ;;  %v3211_v45 = vpop.permute.xlu0 %3210  ;;  %v1974_v27 = vpack.c.bf16 %v1939_v48, %v1938_v53  ;;  %v577_v4 = vsel %vm524_vm0, %v6476_v42, %v6475_v33  ;;  %v6477_v32 = vrot.slane %v4699_v28, 3  ;;  %v6478_v36 = vmov %v6473_v55 }
  0xb9   : > { %v3213_v0 = vunpack.i.h.bf16 %v3211_v45  ;;  %v3212_v31 = vunpack.i.l.bf16 %v3211_v45  ;;  %v1058_v13 = vrot.slane %v4726_v60, 4  ;;  %v6479_v59 = vpack.i.bf16 %v4643_v51, %v4633_v1 }
  0xba   : > { %3505 = vrot.lane.b32.xlu1 %v4638_v20, %s3937_s23  ;;  %3500 = vrot.lane.b32.xlu0 %v4605_v63, %s3937_s23  ;;  %v4865_v44 = vsel %vm827_vm2, %v6478_v36, %v6477_v32  ;;  %v4873_v34 = vpack.i.bf16 %v577_v4, %v4769_v49  ;;  %v6480_v53 = vrot.slane %v4726_v60, 3  ;;  %v6481_v48 = vmov %v6477_v32 }
  0xbb   : > { %2927 = vmatprep.mubr.msk.bf16.mxu0 %vm2012_vm14, %v1974_v27  ;;  %v1940_v19 = vsel %vm1937_vm13, %v1903_v24, %v3212_v31  ;;  %v1941_v47 = vsel %vm1937_vm13, %v1904_v23, %v3213_v0  ;;  %v6482_v45 = vrot.slane %v4699_v28, 4  ;;  %v6483_v27 = vrot.slane %v4551_v29, 4 }
  0xbc   : > { %v4850_v52 = vpop.permute.xlu1 %3225  ;;  %v4858_v63 = vpop.permute.xlu0 %3220  ;;  %v1975_v46 = vpack.c.bf16 %v1941_v47, %v1940_v19  ;;  %v4880_v39 = vsel %vm827_vm2, %v6481_v48, %v6480_v53  ;;  %v6484_v1 = vpack.i.bf16 %v4651_v16, %v4648_v22  ;;  %v1357_v49 = vrot.slane %v4726_v60, 5 }
  0xbd   : > { %v1057_v51 = vsel %vm1010_vm3, %v6483_v27, %v6482_v45  ;;  %v1355_v55 = vrot.slane %v4699_v28, 5  ;;  %v391_v3 = vrot.slane %v4699_v28, 1  ;;  %v1060_v7 = vrot.slane %v4853_v9, 4 }
  0xbe   : > { %3515 = vrot.lane.b32.xlu1 %v6479_v59, %s3938_s26  ;;  %3510 = vrot.lane.b32.xlu0 %v6484_v1, %s3938_s26  ;;  %v6428_v0 = vrot.slane %v4856_v18, 4  ;;  %v1359_v31 = vrot.slane %v4853_v9, 5  ;;  %v6427_v24 = vrot.slane %v4856_v18, 5  ;;  %v393_v16 = vrot.slane %v4726_v60, 1 }
  0xbf   : > { %2928 = vmatmul.mubr.msk.bf16.vlgmr.msra.gmra.mrb[0].mxu0 %vm2012_vm14, %v1975_v46  ;;  %v1538_v23 = vrot.slane %v4699_v28, 6  ;;  %v1540_v33 = vrot.slane %v4726_v60, 6  ;;  %v395_v42 = vrot.slane %v4853_v9, 1  ;;  %v6485_v4 = vpack.i.bf16 %v4661_v54, %v4658_v30 }
  0xc0   : > { %v4897_v50 = vpop.permute.xlu1 %3235  ;;  %v4903_v22 = vpop.permute.xlu0 %3230  ;;  %v6426_v47 = vrot.slane %v4856_v18, 1  ;;  %v1542_v46 = vrot.slane %v4853_v9, 6  ;;  %v6425_v32 = vrot.slane %v4856_v18, 6  ;;  %v6486_v36 = vpack.i.bf16 %v4669_v14, %v4666_v37 }
  0xc1   : > { %v6487_v59 = vmov %v6482_v45  ;;  %v6488_v30 = vrot.slane %v4551_v29, 5  ;;  %v4931_v48 = vsel %vm1313_vm4, %v1355_v55, %v1357_v49  ;;  %v6489_v45 = vrot.slane %v4551_v29, 1 }
  0xc2   : > { %3525 = vrot.lane.b32.xlu1 %v6485_v4, %s3933_s5  ;;  %3520 = vrot.lane.b32.xlu0 %v6486_v36, %s3939_s27  ;;  %v1059_v53 = vsel %vm1010_vm3, %v6487_v59, %v1058_v13  ;;  %v1061_v37 = vsel %vm1010_vm3, %v1058_v13, %v1060_v7  ;;  %v1063_v14 = vsel %vm1010_vm3, %v1060_v7, %v6428_v0  ;;  %v6490_v13 = vrot.slane %v4551_v29, 6 }
  0xc3   : > { %v4928_v54 = vsel %vm1313_vm4, %v6488_v30, %v1355_v55  ;;  %v4936_v27 = vsel %vm341_vm1, %v6489_v45, %v391_v3  ;;  %v4945_v4 = vsel %vm1313_vm4, %v1357_v49, %v1359_v31  ;;  %v4950_v55 = vsel %vm1313_vm4, %v1359_v31, %v6427_v24 }
  0xc4   : > { %v4938_v1 = vpop.permute.xlu1 %3245  ;;  %v4952_v36 = vpop.permute.xlu0 %3240  ;;  %v4955_v59 = vsel %vm341_vm1, %v391_v3, %v393_v16  ;;  %v4960_v30 = vsel %vm1496_vm5, %v6490_v13, %v1538_v23  ;;  %v4963_v7 = vsel %vm1496_vm5, %v1538_v23, %v1540_v33  ;;  %v4966_v49 = vsel %vm341_vm1, %v393_v16, %v395_v42 }
  0xc5   : > { %v6491_v31 = vpack.i.bf16 %v4679_v21, %v4674_v57  ;;  %v4975_v3 = vsel %vm341_vm1, %v395_v42, %v6426_v47  ;;  %v4978_v45 = vsel %vm1496_vm5, %v1540_v33, %v1542_v46  ;;  %v4983_v23 = vsel %vm1496_vm5, %v1542_v46, %v6425_v32  ;;  %v4998_v33 = vld [vmem:[%s4024_s30 + $0x78] sm:$0xff]  }
  0xc6   : > { %v578_v16 = vrot.slane %v4853_v9, 2  ;;  %v6492_v57 = vpack.i.bf16 %v4687_v26, %v4682_v35  ;;  %v4990_v21 = vpack.i.bf16 %v1059_v53, %v1057_v51  ;;  %v4993_v42 = vunpack.c.h.bf16 %v4832_v41 }
  0xc7   : > { %3535 = vrot.lane.b32.xlu1 %v6491_v31, %s3933_s5  ;;  %v4995_v13 = vpack.i.bf16 %v1063_v14, %v1061_v37  ;;  %v3218_v14 = vunpack.i.h.bf16 %v4818_v38  ;;  %v6493_v47 = vrot.slane %v4726_v60, 2  ;;  %v5027_v41 = vunpack.c.l.bf16 %v4998_v33 }
  0xc8   : > { %3530 = vrot.lane.b32.xlu0 %v6492_v57, %s3939_s27  ;;  %v5000_v31 = vpop.permute.xlu1 %3255  ;;  %v5008_v26 = vpop.permute.xlu0 %3250  ;;  %v3217_v57 = vunpack.i.l.bf16 %v4818_v38  ;;  %v3208_v51 = vunpack.i.h.bf16 %v4802_v25  ;;  %v3207_v53 = vunpack.i.l.bf16 %v4802_v25  ;;  %v3228_v35 = vunpack.i.h.bf16 %v4850_v52 }
  0xc9   : > { %v5024_v24 = vsel %vm524_vm0, %v6493_v47, %v578_v16  ;;  %v3227_v0 = vunpack.i.l.bf16 %v4850_v52  ;;  %v3223_v38 = vunpack.i.h.bf16 %v4858_v63  ;;  %v3222_v32 = vunpack.i.l.bf16 %v4858_v63 }
  0xca   : > { %v3238_v19 = vunpack.i.h.bf16 %v4897_v50  ;;  %v3237_v25 = vunpack.i.l.bf16 %v4897_v50  ;;  %v6494_v52 = vrot.slane %v4856_v18, 2  ;;  %v1686_v63 = vsel %vm1678_vm6, %v4100_v62, %v3218_v14 }
  0xcb   : > { %3545 = vrot.lane.b32.xlu1 %v4723_v43, %s3932_s4  ;;  %v1685_v46 = vsel %vm1678_vm6, %v4045_v12, %v3217_v57  ;;  %v3233_v61 = vunpack.i.h.bf16 %v4903_v22  ;;  %v3232_v28 = vunpack.i.l.bf16 %v4903_v22  ;;  %v1684_v50 = vsel %vm1678_vm6, %v4043_v11, %v3208_v51 }
  0xcc   : > { %3540 = vrot.lane.b32.xlu0 %v4598_v58, %s3932_s4  ;;  %v5037_v47 = vpop.permute.xlu1 %3265  ;;  %v3261_v37 = vpop.permute.xlu0 %3260  ;;  %v5046_v29 = vsel %vm524_vm0, %v578_v16, %v6494_v52  ;;  %v1683_v16 = vsel %vm1678_vm6, %v4041_v10, %v3207_v53  ;;  %v1722_v52 = vsel %vm1715_vm7, %v1685_v46, %v3227_v0  ;;  %v1723_v62 = vsel %vm1715_vm7, %v1686_v63, %v3228_v35 }
  0xcd   : > { %v1721_v12 = vsel %vm1715_vm7, %v1684_v50, %v3223_v38  ;;  %v1720_v22 = vsel %vm1715_vm7, %v1683_v16, %v3222_v32  ;;  %v3243_v14 = vunpack.i.h.bf16 %v4952_v36  ;;  %v3242_v57 = vunpack.i.l.bf16 %v4952_v36 }
  0xce   : > { %v1759_v11 = vsel %vm1752_vm8, %v1722_v52, %v3237_v25  ;;  %v1760_v10 = vsel %vm1752_vm8, %v1723_v62, %v3238_v19  ;;  %v3253_v0 = vunpack.i.h.bf16 %v5008_v26  ;;  %v3252_v46 = vunpack.i.l.bf16 %v5008_v26 }
  0xcf   : > { %3555 = vrot.lane.b32.xlu1 %v4873_v34, %s3934_s6  ;;  %v1758_v51 = vsel %vm1752_vm8, %v1721_v12, %v3233_v61  ;;  %v3263_v53 = vunpack.i.h.bf16 %v3261_v37  ;;  %v3262_v32 = vunpack.i.l.bf16 %v3261_v37  ;;  %v6495_v36 = vpack.i.bf16 %v4880_v39, %v4865_v44 }
  0xd0   : > { %3550 = vrot.lane.b32.xlu0 %v4723_v43, %s3934_s6  ;;  %v3276_v58 = vpop.permute.xlu1 %3275  ;;  %v3271_v35 = vpop.permute.xlu0 %3270  ;;  %v1757_v43 = vsel %vm1752_vm8, %v1720_v22, %v3232_v28  ;;  %v3248_v38 = vunpack.i.h.bf16 %v4938_v1  ;;  %v3247_v19 = vunpack.i.l.bf16 %v4938_v1  ;;  %v6496_v26 = vpack.i.bf16 %v4829_v56, %v4776_v5 }
  0xd1   : > { %v3273_v25 = vunpack.i.h.bf16 %v3271_v35  ;;  %v3272_v63 = vunpack.i.l.bf16 %v3271_v35  ;;  %v1794_v28 = vsel %vm1789_vm9, %v1757_v43, %v3242_v57  ;;  %v1795_v61 = vsel %vm1789_vm9, %v1758_v51, %v3243_v14 }
  0xd2   : > { %v3258_v37 = vunpack.i.h.bf16 %v5000_v31  ;;  %v3257_v44 = vunpack.i.l.bf16 %v5000_v31  ;;  %v1831_v50 = vsel %vm1826_vm10, %v1794_v28, %v3252_v46  ;;  %v1832_v1 = vsel %vm1826_vm10, %v1795_v61, %v3253_v0 }
  0xd3   : > { %3565 = vrot.lane.b32.xlu1 %v6495_v36, %s3935_s9  ;;  %v3268_v16 = vunpack.i.h.bf16 %v5037_v47  ;;  %v3267_v52 = vunpack.i.l.bf16 %v5037_v47  ;;  %v1868_v56 = vsel %vm1863_vm11, %v1831_v50, %v3262_v32  ;;  %v1869_v62 = vsel %vm1863_vm11, %v1832_v1, %v3263_v53  ;;  %v5110_v53 = vld [vmem:[%s4024_s30 + $0x80] sm:$0xff]  }
  0xd4   : > { %3560 = vrot.lane.b32.xlu0 %v6496_v26, %s3935_s9  ;;  %v5089_v39 = vpop.permute.xlu1 %3285  ;;  %v3281_v5 = vpop.permute.xlu0 %3280  ;;  %v3278_v31 = vunpack.i.h.bf16 %v3276_v58  ;;  %v3277_v14 = vunpack.i.l.bf16 %v3276_v58  ;;  %v1905_v57 = vsel %vm1900_vm12, %v1868_v56, %v3272_v63  ;;  %v1906_v0 = vsel %vm1900_vm12, %v1869_v62, %v3273_v25 }
  0xd5   : > { %v3283_v12 = vunpack.i.h.bf16 %v3281_v5  ;;  %v3282_v22 = vunpack.i.l.bf16 %v3281_v5  ;;  %v1796_v47 = vsel %vm1789_vm9, %v1759_v11, %v3247_v19  ;;  %v1797_v46 = vsel %vm1789_vm9, %v1760_v10, %v3248_v38 }
  0xd6   : > { %v1833_v58 = vsel %vm1826_vm10, %v1796_v47, %v3257_v44  ;;  %v1834_v32 = vsel %vm1826_vm10, %v1797_v46, %v3258_v37  ;;  %v5125_v28 = vunpack.c.h.bf16 %v4998_v33  ;;  %v5128_v61 = vunpack.c.l.bf16 %v5110_v53 }
  0xd7   : > { %3575 = vrot.lane.b32.xlu1 %v4990_v21, %s3936_s18  ;;  %v1942_v35 = vsel %vm1937_vm13, %v1905_v57, %v3282_v22  ;;  %v1943_v43 = vsel %vm1937_vm13, %v1906_v0, %v3283_v12  ;;  %v1870_v11 = vsel %vm1863_vm11, %v1833_v58, %v3267_v52  ;;  %v1871_v10 = vsel %vm1863_vm11, %v1834_v32, %v3268_v16 }
  0xd8   : > { %3570 = vrot.lane.b32.xlu0 %v4638_v20, %s3936_s18  ;;  %v5107_v51 = vpop.permute.xlu1 %3295  ;;  %v3291_v36 = vpop.permute.xlu0 %3290  ;;  %v1976_v25 = vpack.c.bf16 %v1943_v43, %v1942_v35  ;;  %v584_v20 = vrot.slane %v5027_v41, 2  ;;  %v1907_v63 = vsel %vm1900_vm12, %v1870_v11, %v3277_v14  ;;  %v1908_v26 = vsel %vm1900_vm12, %v1871_v10, %v3278_v31 }
  0xd9   : > { %v3293_v38 = vunpack.i.h.bf16 %v3291_v36  ;;  %v3292_v19 = vunpack.i.l.bf16 %v3291_v36  ;;  %v881_v1 = vrot.slane %v4993_v42, 3  ;;  %v1064_v16 = vrot.slane %v4993_v42, 4 }
  0xda   : > { %2931 = vmatprep.mubr.msk.bf16.mxu0 %vm2012_vm14, %v1976_v25  ;;  %v5140_v33 = vpack.i.bf16 %v5046_v29, %v5024_v24  ;;  %v6497_v5 = vrot.slane %v4993_v42, 2  ;;  %v6498_v56 = vrot.slane %v4856_v18, 2  ;;  %v6435_v12 = vrot.slane %v5027_v41, 3 }
  0xdb   : > { %3585 = vrot.lane.b32.xlu1 %v4995_v13, %s3937_s23  ;;  %v1945_v37 = vsel %vm1937_vm13, %v1908_v26, %v3293_v38  ;;  %v1944_v44 = vsel %vm1937_vm13, %v1907_v63, %v3292_v19  ;;  %v6499_v22 = vpack.i.bf16 %v4950_v55, %v4945_v4  ;;  %v6501_v24 = vrot.slane %v4853_v9, 3 }
  0xdc   : > { %3580 = vrot.lane.b32.xlu0 %v4990_v21, %s3937_s23  ;;  %v5132_v50 = vpop.permute.xlu1 %3305  ;;  %v5136_v52 = vpop.permute.xlu0 %3300  ;;  %v1977_v21 = vpack.c.bf16 %v1945_v37, %v1944_v44  ;;  %v583_v62 = vsel %vm524_vm0, %v6498_v56, %v6497_v5  ;;  %v6500_v31 = vmov %v6497_v5  ;;  %v6502_v14 = vrot.slane %v4726_v60, 3 }
  0xdd   : > { %v585_v29 = vsel %vm524_vm0, %v6500_v31, %v584_v20  ;;  %v6503_v0 = vrot.slane %v4856_v18, 3  ;;  %v6504_v47 = vmov %v6501_v24  ;;  %v1066_v55 = vrot.slane %v5027_v41, 4 }
  0xde   : > { %v5162_v57 = vsel %vm827_vm2, %v6502_v14, %v6501_v24  ;;  %v6505_v46 = vpack.i.bf16 %v4931_v48, %v4928_v54  ;;  %2932 = vmatmul.mubr.msk.bf16.gmra.mrb[4].mxu0 %vm2012_vm14, %v1977_v21  ;;  %v1068_v35 = vrot.slane %v5125_v28, 4  ;;  %v6434_v43 = vrot.slane %v5128_v61, 4 }
  0xdf   : > { %3595 = vrot.lane.b32.xlu1 %v6499_v22, %s3938_s26  ;;  %v5169_v4 = vsel %vm827_vm2, %v6504_v47, %v6503_v0  ;;  %v1365_v58 = vrot.slane %v5027_v41, 5  ;;  %v1367_v32 = vrot.slane %v5125_v28, 5  ;;  %v6432_v25 = vrot.slane %v5128_v61, 5 }
  0xe0   : > { %3590 = vrot.lane.b32.xlu0 %v6505_v46, %s3938_s26  ;;  %v5181_v36 = vpop.permute.xlu1 %3315  ;;  %v1363_v11 = vrot.slane %v4993_v42, 5  ;;  %v399_v10 = vrot.slane %v4993_v42, 1  ;;  %v5186_v54 = vpop.permute.xlu0 %3310  ;;  %v6506_v48 = vmov %v6503_v0  ;;  %v3639_v19 = vpack.i.bf16 %v5169_v4, %v5162_v57 }
  0xe1   : > { %v5191_v38 = vsel %vm827_vm2, %v6506_v48, %v881_v1  ;;  %v6507_v63 = vrot.slane %v4856_v18, 4  ;;  %v401_v37 = vrot.slane %v5027_v41, 1  ;;  %v6508_v44 = vpack.i.bf16 %v4955_v59, %v4936_v27 }
  0xe2   : > { %v5203_v21 = vpack.i.bf16 %v585_v29, %v583_v62  ;;  %v5208_v5 = vsel %vm827_vm2, %v881_v1, %v6435_v12  ;;  %v1546_v56 = vrot.slane %v4993_v42, 6  ;;  %v1548_v22 = vrot.slane %v5027_v41, 6 }
  0xe3   : > { %v1065_v26 = vsel %vm1010_vm3, %v6507_v63, %v1064_v16  ;;  %3605 = vrot.lane.b32.xlu1 %v6508_v44, %s3933_s5  ;;  %v6509_v31 = vpack.i.bf16 %v4963_v7, %v4960_v30  ;;  %v1067_v24 = vsel %vm1010_vm3, %v1064_v16, %v1066_v55  ;;  %v1069_v27 = vsel %vm1010_vm3, %v1066_v55, %v1068_v35 }
  0xe4   : > { %v1071_v59 = vsel %vm1010_vm3, %v1068_v35, %v6434_v43  ;;  %v5222_v1 = vsel %vm1313_vm4, %v1365_v58, %v1367_v32  ;;  %v5224_v62 = vpop.permute.xlu1 %3325  ;;  %v5229_v29 = vsel %vm1313_vm4, %v1367_v32, %v6432_v25  ;;  %v6510_v30 = vrot.slane %v4856_v18, 5  ;;  %v5244_v47 = vpop.permute.xlu0 %3320 }
  0xe5   : > { %3600 = vrot.lane.b32.xlu0 %v6509_v31, %s3939_s27  ;;  %v5237_v16 = vsel %vm1313_vm4, %v1363_v11, %v1365_v58  ;;  %v6511_v14 = vrot.slane %v4856_v18, 1  ;;  %v5247_v55 = vsel %vm341_vm1, %v399_v10, %v401_v37  ;;  %v403_v46 = vrot.slane %v5125_v28, 1 }
  0xe6   : > { %v5234_v7 = vsel %vm1313_vm4, %v6510_v30, %v1363_v11  ;;  %v6431_v35 = vrot.slane %v5128_v61, 1  ;;  %v1550_v32 = vrot.slane %v5125_v28, 6  ;;  %v6512_v58 = vpack.i.bf16 %v4975_v3, %v4966_v49 }
  0xe7   : > { %v5242_v0 = vsel %vm341_vm1, %v6511_v14, %v399_v10  ;;  %v6513_v11 = vrot.slane %v4856_v18, 6  ;;  %v5262_v63 = vsel %vm1496_vm5, %v1546_v56, %v1548_v22  ;;  %v6433_v10 = vrot.slane %v5128_v61, 6 }
  0xe8   : > { %3615 = vrot.lane.b32.xlu1 %v6512_v58, %s3933_s5  ;;  %v586_v44 = vrot.slane %v5125_v28, 2  ;;  %v6514_v31 = vpack.i.bf16 %v4983_v23, %v4978_v45  ;;  %v3644_v49 = vpack.i.bf16 %v5208_v5, %v5191_v38  ;;  %v5272_v3 = vpack.i.bf16 %v1067_v24, %v1065_v26  ;;  %v5276_v14 = vpop.permute.xlu1 %3335 }
  0xe9   : > { %v5259_v48 = vsel %vm1496_vm5, %v6513_v11, %v1546_v56  ;;  %v5274_v30 = vpack.i.bf16 %v1071_v59, %v1069_v27  ;;  %v6436_v23 = vrot.slane %v5128_v61, 2  ;;  %v5285_v11 = vpop.permute.xlu0 %3330  ;;  %v5290_v26 = vsel %vm341_vm1, %v401_v37, %v403_v46 }
  0xea   : > { %3610 = vrot.lane.b32.xlu0 %v6514_v31, %s3939_s27  ;;  %v5295_v5 = vsel %vm341_vm1, %v403_v46, %v6431_v35  ;;  %v5298_v24 = vsel %vm1496_vm5, %v1548_v22, %v1550_v32  ;;  %v3298_v27 = vunpack.i.h.bf16 %v5107_v51  ;;  %v3297_v59 = vunpack.i.l.bf16 %v5107_v51  ;;  %v5315_v31 = vld [vmem:[%s4024_s30 + $0x88] sm:$0xff]  }
  0xeb   : > { %v5307_v37 = vsel %vm1496_vm5, %v1550_v32, %v6433_v10  ;;  %v5312_v46 = vsel %vm524_vm0, %v584_v20, %v586_v44  ;;  %v3288_v22 = vunpack.i.h.bf16 %v5089_v39  ;;  %v3287_v35 = vunpack.i.l.bf16 %v5089_v39 }
  0xec   : > { %3625 = vrot.lane.b32.xlu1 %v5140_v33, %s3932_s4  ;;  %v3308_v51 = vunpack.i.h.bf16 %v5132_v50  ;;  %v3307_v25 = vunpack.i.l.bf16 %v5132_v50  ;;  %v3303_v32 = vunpack.i.h.bf16 %v5136_v52  ;;  %v3302_v10 = vunpack.i.l.bf16 %v5136_v52  ;;  %v5325_v43 = vpop.permute.xlu1 %3345 }
  0xed   : > { %v5330_v20 = vsel %vm524_vm0, %v586_v44, %v6436_v23  ;;  %v5333_v39 = vunpack.c.h.bf16 %v5110_v53  ;;  %v3318_v38 = vunpack.i.h.bf16 %v5181_v36  ;;  %v3317_v50 = vunpack.i.l.bf16 %v5181_v36  ;;  %v3341_v12 = vpop.permute.xlu0 %3340 }
  0xee   : > { %3620 = vrot.lane.b32.xlu0 %v4873_v34, %s3932_s4  ;;  %v5338_v34 = vunpack.c.l.bf16 %v5315_v31  ;;  %v1690_v45 = vsel %vm1678_vm6, %v4220_v40, %v3298_v27  ;;  %v1689_v44 = vsel %vm1678_vm6, %v4182_v15, %v3297_v59  ;;  %v3313_v23 = vunpack.i.h.bf16 %v5186_v54 }
  0xef   : > { %v3312_v53 = vunpack.i.l.bf16 %v5186_v54  ;;  %v1688_v36 = vsel %vm1678_vm6, %v4180_v8, %v3288_v22  ;;  %v1687_v58 = vsel %vm1678_vm6, %v4105_v2, %v3287_v35  ;;  %v1726_v52 = vsel %vm1715_vm7, %v1689_v44, %v3307_v25 }
  0xf0   : > { %3635 = vrot.lane.b32.xlu1 %v5203_v21, %s3934_s6  ;;  %v1727_v40 = vsel %vm1715_vm7, %v1690_v45, %v3308_v51  ;;  %v1725_v15 = vsel %vm1715_vm7, %v1688_v36, %v3303_v32  ;;  %v1724_v54 = vsel %vm1715_vm7, %v1687_v58, %v3302_v10  ;;  %v3323_v27 = vunpack.i.h.bf16 %v5244_v47  ;;  %v3356_v56 = vpop.permute.xlu1 %3355 }
  0xf1   : > { %v3322_v59 = vunpack.i.l.bf16 %v5244_v47  ;;  %v1763_v8 = vsel %vm1752_vm8, %v1726_v52, %v3317_v50  ;;  %v1764_v2 = vsel %vm1752_vm8, %v1727_v40, %v3318_v38  ;;  %v3333_v25 = vunpack.i.h.bf16 %v5285_v11  ;;  %v3351_v45 = vpop.permute.xlu0 %3350 }
  0xf2   : > { %3630 = vrot.lane.b32.xlu0 %v5140_v33, %s3934_s6  ;;  %v3332_v35 = vunpack.i.l.bf16 %v5285_v11  ;;  %v1761_v33 = vsel %vm1752_vm8, %v1724_v54, %v3312_v53  ;;  %v1762_v22 = vsel %vm1752_vm8, %v1725_v15, %v3313_v23  ;;  %v3343_v51 = vunpack.i.h.bf16 %v3341_v12 }
  0xf3   : > { %v3342_v10 = vunpack.i.l.bf16 %v3341_v12  ;;  %v3328_v47 = vunpack.i.h.bf16 %v5224_v62  ;;  %v3327_v58 = vunpack.i.l.bf16 %v5224_v62  ;;  %v3353_v32 = vunpack.i.h.bf16 %v3351_v45 }
  0xf4   : > { %3645 = vrot.lane.b32.xlu1 %v3644_v49, %s3935_s9  ;;  %v3352_v50 = vunpack.i.l.bf16 %v3351_v45  ;;  %v1798_v11 = vsel %vm1789_vm9, %v1761_v33, %v3322_v59  ;;  %v1799_v38 = vsel %vm1789_vm9, %v1762_v22, %v3323_v27  ;;  %v3338_v23 = vunpack.i.h.bf16 %v5276_v14  ;;  %v5378_v49 = vpop.permute.xlu1 %3365 }
  0xf5   : > { %v3337_v12 = vunpack.i.l.bf16 %v5276_v14  ;;  %v1835_v52 = vsel %vm1826_vm10, %v1798_v11, %v3332_v35  ;;  %v1836_v62 = vsel %vm1826_vm10, %v1799_v38, %v3333_v25  ;;  %v3348_v44 = vunpack.i.h.bf16 %v5325_v43  ;;  %v3361_v57 = vpop.permute.xlu0 %3360 }
  0xf6   : > { %3640 = vrot.lane.b32.xlu0 %v3639_v19, %s3935_s9  ;;  %v3347_v53 = vunpack.i.l.bf16 %v5325_v43  ;;  %v1872_v4 = vsel %vm1863_vm11, %v1835_v52, %v3342_v10  ;;  %v1873_v19 = vsel %vm1863_vm11, %v1836_v62, %v3343_v51  ;;  %v3363_v36 = vunpack.i.h.bf16 %v3361_v57 }
  0xf7   : > { %v3362_v40 = vunpack.i.l.bf16 %v3361_v57  ;;  %v3358_v14 = vunpack.i.h.bf16 %v3356_v56  ;;  %v3357_v15 = vunpack.i.l.bf16 %v3356_v56  ;;  %v1909_v54 = vsel %vm1900_vm12, %v1872_v4, %v3352_v50 }
  0xf8   : > { %3655 = vrot.lane.b32.xlu1 %v5272_v3, %s3936_s18  ;;  %v1910_v27 = vsel %vm1900_vm12, %v1873_v19, %v3353_v32  ;;  %v1800_v43 = vsel %vm1789_vm9, %v1763_v8, %v3327_v58  ;;  %v1801_v59 = vsel %vm1789_vm9, %v1764_v2, %v3328_v47  ;;  %v5396_v45 = vpop.permute.xlu1 %3375  ;;  %v590_v10 = vrot.slane %v5333_v39, 2  ;;  %v5406_v47 = vld [vmem:[%s4024_s30 + $0x90] sm:$0xff]  }
  0xf9   : > { %v1946_v25 = vsel %vm1937_vm13, %v1909_v54, %v3362_v40  ;;  %v1947_v35 = vsel %vm1937_vm13, %v1910_v27, %v3363_v36  ;;  %v1837_v56 = vsel %vm1826_vm10, %v1800_v43, %v3337_v12  ;;  %v1838_v33 = vsel %vm1826_vm10, %v1801_v59, %v3338_v23  ;;  %v3371_v51 = vpop.permute.xlu0 %3370 }
  0xfa   : > { %3650 = vrot.lane.b32.xlu0 %v4995_v13, %s3936_s18  ;;  %v1978_v22 = vpack.c.bf16 %v1947_v35, %v1946_v25  ;;  %v1874_v13 = vsel %vm1863_vm11, %v1837_v56, %v3347_v53  ;;  %v1875_v8 = vsel %vm1863_vm11, %v1838_v33, %v3348_v44  ;;  %v3373_v58 = vunpack.i.h.bf16 %v3371_v51 }
  0xfb   : > { %v3372_v2 = vunpack.i.l.bf16 %v3371_v51  ;;  %v1911_v32 = vsel %vm1900_vm12, %v1874_v13, %v3357_v15  ;;  %v1912_v50 = vsel %vm1900_vm12, %v1875_v8, %v3358_v14  ;;  %v6442_v11 = vrot.slane %v5338_v34, 2  ;;  %v5491_v13 = vld [vmem:[%s4024_s30 + $0x90] sm:$0x1] }
  0xfc   : > { %3665 = vrot.lane.b32.xlu1 %v5274_v30, %s3937_s23  ;;  %2935 = vmatprep.mubr.msk.bf16.mxu0 %vm2012_vm14, %v1978_v22  ;;  %v889_v38 = vrot.slane %v5333_v39, 3  ;;  %v1949_v23 = vsel %vm1937_vm13, %v1912_v50, %v3373_v58  ;;  %v5417_v52 = vpop.permute.xlu1 %3385  ;;  %v6440_v62 = vrot.slane %v5338_v34, 3  ;;  %v5421_v44 = vunpack.c.h.bf16 %v5315_v31 }
  0xfd   : > { %v1948_v12 = vsel %vm1937_vm13, %v1911_v32, %v3372_v2  ;;  %v5423_v57 = vpop.permute.xlu0 %3380  ;;  %v3689_v4 = vpack.i.bf16 %v5307_v37, %v5298_v24  ;;  %v5430_v19 = vunpack.c.l.bf16 %v5406_v47  ;;  %v6515_v36 = vpack.i.bf16 %v5229_v29, %v5222_v1 }
  0xfe   : > { %3660 = vrot.lane.b32.xlu0 %v5272_v3, %s3937_s23  ;;  %v1979_v53 = vpack.c.bf16 %v1949_v23, %v1948_v12  ;;  %v3694_v3 = vpack.i.bf16 %v5295_v5, %v5290_v26  ;;  %v5438_v31 = vpack.i.bf16 %v5330_v20, %v5312_v46  ;;  %v885_v40 = vrot.slane %v5125_v28, 3 }
  0xff   : > { %v6516_v26 = vpack.i.bf16 %v5237_v16, %v5234_v7  ;;  %v6517_v5 = vrot.slane %v5128_v61, 2  ;;  %v593_v1 = vsel %vm524_vm0, %v590_v10, %v6442_v11  ;;  %v6518_v29 = vrot.slane %v5128_v61, 3 }
 0x100   : > { %3675 = vrot.lane.b32.xlu1 %v6515_v36, %s3938_s26  ;;  %2936 = vmatmul.mubr.msk.bf16.gmra.mrb[8].mxu0 %vm2012_vm14, %v1979_v53  ;;  %v5457_v46 = vpop.permute.xlu1 %3395  ;;  %v5462_v7 = vsel %vm827_vm2, %v889_v38, %v6440_v62  ;;  %v1072_v16 = vrot.slane %v5333_v39, 4  ;;  %v1074_v20 = vrot.slane %v5338_v34, 4  ;;  %v1076_v14 = vrot.slane %v5421_v44, 4 }
 0x101   : > { %v591_v24 = vsel %vm524_vm0, %v6517_v5, %v590_v10  ;;  %v5455_v37 = vsel %vm827_vm2, %v6518_v29, %v889_v38  ;;  %v5467_v15 = vpop.permute.xlu0 %3390  ;;  %v6439_v54 = vrot.slane %v5430_v19, 4  ;;  %v1373_v27 = vrot.slane %v5338_v34, 5 }
 0x102   : > { %3670 = vrot.lane.b32.xlu0 %v6516_v26, %s3938_s26  ;;  %v1375_v43 = vrot.slane %v5421_v44, 5  ;;  %v6438_v59 = vrot.slane %v5430_v19, 5  ;;  %v6519_v25 = vpack.i.bf16 %v5247_v55, %v5242_v0  ;;  %v5477_v35 = vpack.i.bf16 %v593_v1, %v591_v24 }
 0x103   : > { %v6520_v56 = vrot.slane %v5027_v41, 3  ;;  %v6521_v22 = vmov %v6518_v29  ;;  %v1371_v10 = vrot.slane %v5333_v39, 5  ;;  %v6522_v0 = vpack.i.bf16 %v5262_v63, %v5259_v48 }
 0x104   : > { %3685 = vrot.lane.b32.xlu1 %v6519_v25, %s3933_s5  ;;  %v5487_v51 = vsel %vm827_vm2, %v885_v40, %v6521_v22  ;;  %v1556_v55 = vrot.slane %v5338_v34, 6  ;;  %v1558_v8 = vrot.slane %v5421_v44, 6  ;;  %v6437_v58 = vrot.slane %v5430_v19, 6  ;;  %v5501_v32 = vpop.permute.xlu1 %3405 }
 0x105   : > { %v5482_v33 = vsel %vm827_vm2, %v6520_v56, %v885_v40  ;;  %v1554_v2 = vrot.slane %v5333_v39, 6  ;;  %v3724_v50 = vpack.i.bf16 %v5462_v7, %v5455_v37  ;;  %v6523_v38 = vrot.slane %v5128_v61, 4  ;;  %v5510_v12 = vpop.permute.xlu0 %3400 }
 0x106   : > { %3680 = vrot.lane.b32.xlu0 %v6522_v0, %s3939_s27  ;;  %v1075_v48 = vsel %vm1010_vm3, %v1072_v16, %v1074_v20  ;;  %v1077_v63 = vsel %vm1010_vm3, %v1074_v20, %v1076_v14  ;;  %v1079_v53 = vsel %vm1010_vm3, %v1076_v14, %v6439_v54  ;;  %v5516_v36 = vsel %vm1313_vm4, %v1373_v27, %v1375_v43  ;;  %v6528_v54 = vld [vmem:[#allocation5_spill] sm:$0xff] }
 0x107   : > { %v1073_v23 = vsel %vm1010_vm3, %v6523_v38, %v1072_v16  ;;  %v5521_v40 = vsel %vm1313_vm4, %v1375_v43, %v6438_v59  ;;  %v6441_v26 = vunpack.c.l.bf16 %v5491_v13  ;;  %v6524_v24 = vrot.slane %v5128_v61, 5 }
 0x108   : > { %3695 = vrot.lane.b32.xlu1 %v3694_v3, %s3933_s5  ;;  %v5533_v29 = vsel %vm1313_vm4, %v1371_v10, %v1373_v27  ;;  %v5537_v16 = vsel %vm1496_vm5, %v1556_v55, %v1558_v8  ;;  %v5542_v3 = vsel %vm1496_vm5, %v1558_v8, %v6437_v58  ;;  %v6525_v20 = vrot.slane %v5128_v61, 6  ;;  %v5552_v27 = vpop.permute.xlu1 %3415 }
 0x109   : > { %v5530_v1 = vsel %vm1313_vm4, %v6524_v24, %v1371_v10  ;;  %v5550_v43 = vsel %vm1496_vm5, %v1554_v2, %v1556_v55  ;;  %v5554_v25 = vpack.i.bf16 %v1075_v48, %v1073_v23  ;;  %v5560_v22 = vpop.permute.xlu0 %3410  ;;  %v6443_v0 = vrot.slane %v5338_v34, 1  ;;  %v6526_v10 = vld [vmem:[#allocation7_spill] sm:$0xff] }
 0x10a   : > { %3690 = vrot.lane.b32.xlu0 %v3689_v4, %s3939_s27  ;;  %v5547_v14 = vsel %vm1496_vm5, %v6525_v20, %v1554_v2  ;;  %v5556_v4 = vpack.i.bf16 %v1079_v53, %v1077_v63  ;;  %v411_v8 = vrot.slane %v5421_v44, 1  ;;  %v413_v55 = vrot.slane %v6441_v26, 1 }
 0x10b   : > { %v3378_v2 = vunpack.i.h.bf16 %v5396_v45  ;;  %v3377_v38 = vunpack.i.l.bf16 %v5396_v45  ;;  %v3368_v63 = vunpack.i.h.bf16 %v5378_v49  ;;  %v3367_v53 = vunpack.i.l.bf16 %v5378_v49 }
 0x10c   : > { %3705 = vrot.lane.b32.xlu1 %v5438_v31, %s3932_s4  ;;  %v3388_v24 = vunpack.i.h.bf16 %v5417_v52  ;;  %v3387_v20 = vunpack.i.l.bf16 %v5417_v52  ;;  %v3383_v45 = vunpack.i.h.bf16 %v5423_v57  ;;  %v3382_v58 = vunpack.i.l.bf16 %v5423_v57  ;;  %v5584_v59 = vpop.permute.xlu1 %3425 }
 0x10d   : > { %v5588_v62 = vrot.slane %v5421_v44, 2  ;;  %v3398_v49 = vunpack.i.h.bf16 %v5457_v46  ;;  %v3397_v48 = vunpack.i.l.bf16 %v5457_v46  ;;  %v3421_v23 = vpop.permute.xlu0 %3420  ;;  %v5598_v52 = vsel %vm341_vm1, %v411_v8, %v413_v55  ;;  %v6527_v46 = vld [vmem:[#allocation6_spill] sm:$0xff] }
 0x10e   : > { %3700 = vrot.lane.b32.xlu0 %v5203_v21, %s3932_s4  ;;  %v5595_v21 = vsel %vm341_vm1, %v6443_v0, %v411_v8  ;;  %v1694_v57 = vsel %vm1678_vm6, %v4328_v6, %v3378_v2  ;;  %v1693_v56 = vsel %vm1678_vm6, %v6526_v10, %v3377_v38  ;;  %v3393_v26 = vunpack.i.h.bf16 %v5467_v15 }
 0x10f   : > { %v3392_v11 = vunpack.i.l.bf16 %v5467_v15  ;;  %v1692_v0 = vsel %vm1678_vm6, %v6527_v46, %v3368_v63  ;;  %v1691_v8 = vsel %vm1678_vm6, %v6528_v54, %v3367_v53  ;;  %v1730_v55 = vsel %vm1715_vm7, %v1693_v56, %v3387_v20 }
 0x110   : > { %3715 = vrot.lane.b32.xlu1 %v5477_v35, %s3934_s6  ;;  %v1731_v6 = vsel %vm1715_vm7, %v1694_v57, %v3388_v24  ;;  %v1729_v10 = vsel %vm1715_vm7, %v1692_v0, %v3383_v45  ;;  %v1728_v15 = vsel %vm1715_vm7, %v1691_v8, %v3382_v58  ;;  %v3403_v2 = vunpack.i.h.bf16 %v5510_v12  ;;  %v3436_v5 = vpop.permute.xlu1 %3435 }
 0x111   : > { %v3402_v38 = vunpack.i.l.bf16 %v5510_v12  ;;  %v1767_v63 = vsel %vm1752_vm8, %v1730_v55, %v3397_v48  ;;  %v1768_v54 = vsel %vm1752_vm8, %v1731_v6, %v3398_v49  ;;  %v3413_v56 = vunpack.i.h.bf16 %v5560_v22  ;;  %v3431_v24 = vpop.permute.xlu0 %3430 }
 0x112   : > { %3710 = vrot.lane.b32.xlu0 %v5438_v31, %s3934_s6  ;;  %v3412_v53 = vunpack.i.l.bf16 %v5560_v22  ;;  %v1765_v31 = vsel %vm1752_vm8, %v1728_v15, %v3392_v11  ;;  %v1766_v0 = vsel %vm1752_vm8, %v1729_v10, %v3393_v26  ;;  %v3423_v20 = vunpack.i.h.bf16 %v3421_v23 }
 0x113   : > { %v3422_v58 = vunpack.i.l.bf16 %v3421_v23  ;;  %v3408_v12 = vunpack.i.h.bf16 %v5501_v32  ;;  %v3407_v48 = vunpack.i.l.bf16 %v5501_v32  ;;  %v3433_v45 = vunpack.i.h.bf16 %v3431_v24 }
 0x114   : > { %3725 = vrot.lane.b32.xlu1 %v3724_v50, %s3935_s9  ;;  %v3432_v49 = vunpack.i.l.bf16 %v3431_v24  ;;  %v6529_v22 = vpack.i.bf16 %v5487_v51, %v5482_v33  ;;  %v1802_v11 = vsel %vm1789_vm9, %v1765_v31, %v3402_v38  ;;  %v1803_v26 = vsel %vm1789_vm9, %v1766_v0, %v3403_v2  ;;  %v5640_v7 = vpop.permute.xlu1 %3445  ;;  %v283_v31 = vld [vmem:[%s4024_s30 + $0x98] sm:$0x1] }
 0x115   : > { %v3418_v23 = vunpack.i.h.bf16 %v5552_v27  ;;  %v3417_v37 = vunpack.i.l.bf16 %v5552_v27  ;;  %v1839_v50 = vsel %vm1826_vm10, %v1802_v11, %v3412_v53  ;;  %v1840_v32 = vsel %vm1826_vm10, %v1803_v26, %v3413_v56  ;;  %v3441_v33 = vpop.permute.xlu0 %3440 }
 0x116   : > { %3720 = vrot.lane.b32.xlu0 %v6529_v22, %s3935_s9  ;;  %v3428_v57 = vunpack.i.h.bf16 %v5584_v59  ;;  %v3427_v46 = vunpack.i.l.bf16 %v5584_v59  ;;  %v1876_v51 = vsel %vm1863_vm11, %v1839_v50, %v3422_v58  ;;  %v1877_v8 = vsel %vm1863_vm11, %v1840_v32, %v3423_v20  ;;  %v2819_v50 = vld [vmem:[%s4024_s30 + $0x98] sm:$0xff]   ;;  %v295_v32 = vld [vmem:[%s4024_s30 + $0xa0] sm:$0x3] }
 0x117   : > { %v3443_v55 = vunpack.i.h.bf16 %v3441_v33  ;;  %v3442_v6 = vunpack.i.l.bf16 %v3441_v33  ;;  %v3438_v27 = vunpack.i.h.bf16 %v3436_v5  ;;  %v3437_v10 = vunpack.i.l.bf16 %v3436_v5 }
 0x118   : > { %3735 = vrot.lane.b32.xlu1 %v5554_v25, %s3936_s18  ;;  %v1913_v15 = vsel %vm1900_vm12, %v1876_v51, %v3432_v49  ;;  %v1914_v2 = vsel %vm1900_vm12, %v1877_v8, %v3433_v45  ;;  %v1804_v59 = vsel %vm1789_vm9, %v1767_v63, %v3407_v48  ;;  %v1805_v38 = vsel %vm1789_vm9, %v1768_v54, %v3408_v12  ;;  %v5658_v24 = vpop.permute.xlu1 %3455  ;;  %v288_v12 = vld [vmem:[%s4024_s30 + $0x98] sm:$0x3] }
 0x119   : > { %v1950_v56 = vsel %vm1937_vm13, %v1913_v15, %v3442_v6  ;;  %v1951_v53 = vsel %vm1937_vm13, %v1914_v2, %v3443_v55  ;;  %v1841_v5 = vsel %vm1826_vm10, %v1804_v59, %v3417_v37  ;;  %v1842_v0 = vsel %vm1826_vm10, %v1805_v38, %v3418_v23  ;;  %v3451_v58 = vpop.permute.xlu0 %3450  ;;  %v5695_v6 = vld [vmem:[%s4024_s30 + $0xa0] sm:$0x7]  ;;  %s186_s30 = sand.u32 1, %s3914_s13  }
 0x11a   : > { %3730 = vrot.lane.b32.xlu0 %v5274_v30, %s3936_s18  ;;  %v1980_v20 = vpack.c.bf16 %v1951_v53, %v1950_v56  ;;  %v6530_v30 = vrot.slane %v5333_v39, 1  ;;  %v6531_v63 = vrot.slane %v5128_v61, 1  ;;  %v1878_v48 = vsel %vm1863_vm11, %v1841_v5, %v3427_v46  ;;  %s2591_s11 = scalar_lea.sflag [#allocation3], %s186_s30 }
 0x11b   : > { %v1879_v45 = vsel %vm1863_vm11, %v1842_v0, %v3428_v57  ;;  %v3453_v49 = vunpack.i.h.bf16 %v3451_v58  ;;  %v3452_v22 = vunpack.i.l.bf16 %v3451_v58  ;;  %v1915_v11 = vsel %vm1900_vm12, %v1878_v48, %v3437_v10 }
 0x11c   : > { %v5668_v54 = vsel %vm341_vm1, %v6531_v63, %v6530_v30  ;;  %3745 = vrot.lane.b32.xlu1 %v5556_v4, %s3937_s23  ;;  %v1916_v26 = vsel %vm1900_vm12, %v1879_v45, %v3438_v27  ;;  %2939 = vmatprep.mubr.msk.bf16.mxu0 %vm2012_vm14, %v1980_v20  ;;  %v5681_v23 = vunpack.c.h.bf16 %v5406_v47  ;;  %v287_v37 = vunpack.c.l.bf16 %v283_v31  ;;  %v5687_v33 = vpop.permute.xlu1 %3465 }
 0x11d   : > { %v1953_v57 = vsel %vm1937_vm13, %v1916_v26, %v3453_v49  ;;  %v1952_v46 = vsel %vm1937_vm13, %v1915_v11, %v3452_v22  ;;  %v6532_v51 = vrot.slane %v5338_v34, 1  ;;  %v6533_v8 = vmov %v6530_v30  ;;  %v5697_v27 = vpop.permute.xlu0 %3460 }
 0x11e   : > { %3740 = vrot.lane.b32.xlu0 %v5554_v25, %s3937_s23  ;;  %v289_v55 = vunpack.c.l.bf16 %v288_v12  ;;  %v1981_v47 = vpack.c.bf16 %v1953_v57, %v1952_v46  ;;  %v3774_v10 = vpack.i.bf16 %v5598_v52, %v5595_v21  ;;  %v6534_v15 = vrot.slane %v5338_v34, 2 }
 0x11f   : > { %v410_v25 = vsel %vm341_vm1, %v6533_v8, %v6532_v51  ;;  %v6535_v59 = vunpack.c.l.bf16 %v5491_v13  ;;  %v6536_v56 = vpack.i.bf16 %v5521_v40, %v5516_v36  ;;  %v712_v53 = vrot.slane %v5430_v19, 2 }
 0x120   : > { %v5705_v2 = vsel %vm524_vm0, %v6534_v15, %v5588_v62  ;;  %v5714_v31 = vunpack.c.l.bf16 %v2819_v50  ;;  %v5716_v5 = vunpack.c.h.bf16 %v2819_v50  ;;  %v299_v21 = vunpack.c.l.bf16 %v295_v32  ;;  %2940 = vmatmul.mubr.msk.bf16.gmra.mrb[12].mxu0 %vm2012_vm14, %v1981_v47  ;;  %v5726_v20 = vpop.permute.xlu1 %3475 }
 0x121   : > { %v596_v38 = vrot.slane %v6535_v59, 2  ;;  %3755 = vrot.lane.b32.xlu1 %v6536_v56, %s3938_s26  ;;  %v6537_v52 = vpack.i.bf16 %v5533_v29, %v5530_v1  ;;  %v3769_v13 = vpack.i.bf16 %v410_v25, %v5668_v54  ;;  %v714_v0 = vrot.slane %v5681_v23, 2  ;;  %v5731_v1 = vpop.permute.xlu0 %3470 }
 0x122   : > { %v716_v36 = vrot.slane %v287_v37, 2  ;;  %v301_v40 = vunpack.c.l.bf16 %v5695_v6  ;;  %v895_v58 = vrot.slane %v5430_v19, 3  ;;  %v897_v30 = vrot.slane %v5681_v23, 3  ;;  %v6546_v6 = vld [vmem:[#allocation8_spill] sm:$0xff] }
 0x123   : > { %3750 = vrot.lane.b32.xlu0 %v6537_v52, %s3938_s26  ;;  %v899_v63 = vrot.slane %v289_v55, 3  ;;  %v893_v12 = vrot.slane %v5421_v44, 3  ;;  %v597_v29 = vsel %vm524_vm0, %v5588_v62, %v596_v38  ;;  %v1080_v54 = vrot.slane %v5681_v23, 4 }
 0x124   : > { %v1082_v48 = vrot.slane %v289_v55, 4  ;;  %v6538_v45 = vpack.i.bf16 %v5542_v3, %v5537_v16  ;;  %v5742_v49 = vsel %vm524_vm0, %v5588_v62, %v712_v53  ;;  %v1198_v22 = vrot.slane %v5714_v31, 4  ;;  %v5755_v3 = vpop.permute.xlu1 %3485 }
 0x125   : > { %v1200_v11 = vrot.slane %v5716_v5, 4  ;;  %v1202_v26 = vrot.slane %v299_v21, 4  ;;  %v6539_v37 = vpack.i.bf16 %v5550_v43, %v5547_v14  ;;  %v715_v50 = vsel %vm524_vm0, %v712_v53, %v714_v0  ;;  %v5769_v8 = vpop.permute.xlu0 %3480 }
 0x126   : > { %3765 = vrot.lane.b32.xlu1 %v6538_v45, %s3939_s27  ;;  %v1381_v32 = vrot.slane %v5714_v31, 5  ;;  %v1383_v16 = vrot.slane %v5716_v5, 5  ;;  %v1385_v62 = vrot.slane %v301_v40, 5  ;;  %v717_v57 = vsel %vm524_vm0, %v714_v0, %v716_v36 }
 0x127   : > { %3760 = vrot.lane.b32.xlu0 %v6539_v37, %s3939_s27  ;;  %v5759_v46 = vsel %vm827_vm2, %v895_v58, %v897_v30  ;;  %v5762_v51 = vsel %vm827_vm2, %v897_v30, %v899_v63  ;;  %v6540_v14 = vrot.slane %v5338_v34, 3  ;;  %v5772_v25 = vsel %vm827_vm2, %v893_v12, %v895_v58 }
 0x128   : > { %v6541_v55 = vrot.slane %v5430_v19, 4  ;;  %v5780_v15 = vsel %vm1010_vm3, %v1080_v54, %v1082_v48  ;;  %v1379_v59 = vrot.slane %v5681_v23, 5  ;;  %v3784_v38 = vpack.i.bf16 %v597_v29, %v5705_v2  ;;  %v5803_v58 = vpop.permute.xlu1 %3495 }
 0x129   : > { %v5767_v43 = vsel %vm827_vm2, %v6540_v14, %v893_v12  ;;  %v5786_v56 = vsel %vm1010_vm3, %v1198_v22, %v1200_v11  ;;  %v5789_v53 = vsel %vm1010_vm3, %v1200_v11, %v1202_v26  ;;  %v5792_v21 = vsel %vm1010_vm3, %v1080_v54, %v1198_v22  ;;  %v5811_v12 = vpop.permute.xlu0 %3490 }
 0x12a   : > { %v5777_v47 = vsel %vm1010_vm3, %v6541_v55, %v1080_v54  ;;  %3775 = vrot.lane.b32.xlu1 %v3774_v10, %s3933_s5  ;;  %v3794_v52 = vpack.i.bf16 %v717_v57, %v715_v50  ;;  %v3789_v0 = vpack.i.bf16 %v5742_v49, %v5705_v2  ;;  %v5798_v36 = vsel %vm1313_vm4, %v1381_v32, %v1383_v16  ;;  %v6544_v55 = vld [vmem:[#allocation10_spill] sm:$0xff] }
 0x12b   : > { %3770 = vrot.lane.b32.xlu0 %v3769_v13, %s3933_s5  ;;  %v5801_v10 = vsel %vm1313_vm4, %v1383_v16, %v1385_v62  ;;  %v3804_v30 = vpack.i.bf16 %v5762_v51, %v5759_v46  ;;  %v3799_v63 = vpack.i.bf16 %v5772_v25, %v5767_v43  ;;  %v3814_v13 = vpack.i.bf16 %v5780_v15, %v5777_v47  ;;  %v6543_v25 = vld [vmem:[#allocation11_spill] sm:$0xff]  ;;  %s2718_s5 = sshll.u32 %s3922_s15, 7  ;;  %s3943_s15 = smov [#allocation2]  }
 0x12c   : > { %v3824_v2 = vpack.i.bf16 %v5789_v53, %v5786_v56  ;;  %v3819_v29 = vpack.i.bf16 %v5792_v21, %v5777_v47  ;;  %v6542_v54 = vrot.slane %v5430_v19, 5  ;;  %v5823_v45 = vsel %vm1313_vm4, %v1379_v59, %v1381_v32  ;;  %v5839_v57 = vpop.permute.xlu1 %3505  ;;  %s6357_s10 = scalar_lea.hbm %s6407_s3, %s2718_s5  ;;  %s3856_s19 = sshll.u32 %s3943_s15, 4  ;;  %s3857_s19 = int_to_ptr.vmem [resolvable:$false] %s3856_s19 }
 0x12d   : > { %v3458_v49 = vunpack.i.h.bf16 %v5658_v24  ;;  %v3457_v22 = vunpack.i.l.bf16 %v5658_v24  ;;  %v1564_v26 = vrot.slane %v5714_v31, 6  ;;  %v3448_v37 = vunpack.i.h.bf16 %v5640_v7  ;;  %v3501_v43 = vpop.permute.xlu0 %3500  ;;  %s3858_s21 = scalar_lea.vmem %s3857_s19, 256 }
 0x12e   : > { %v5820_v48 = vsel %vm1313_vm4, %v6542_v54, %v1379_v59  ;;  %3785 = vrot.lane.b32.xlu1 %v3784_v38, %s3932_s4  ;;  %v3447_v50 = vunpack.i.l.bf16 %v5640_v7  ;;  %v3468_v16 = vunpack.i.h.bf16 %v5687_v33  ;;  %v3467_v32 = vunpack.i.l.bf16 %v5687_v33 }
 0x12f   : > { %3780 = vrot.lane.b32.xlu0 %v5477_v35, %s3932_s4  ;;  %v3463_v24 = vunpack.i.h.bf16 %v5697_v27  ;;  %v3462_v62 = vunpack.i.l.bf16 %v5697_v27  ;;  %v1566_v51 = vrot.slane %v5716_v5, 6  ;;  %v3478_v7 = vunpack.i.h.bf16 %v5726_v20  ;;  %s2692_s4 = sshll.u32 %s186_s30, 3 }
 0x130   : > { %v3477_v14 = vunpack.i.l.bf16 %v5726_v20  ;;  %v5848_v33 = vrot.slane %v301_v40, 6  ;;  %v1698_v27 = vsel %vm1678_vm6, %v6543_v25, %v3458_v49  ;;  %v1697_v59 = vsel %vm1678_vm6, %v6544_v55, %v3457_v22  ;;  %v6545_v20 = vld [vmem:[#allocation9_spill] sm:$0xff]  ;;  %v3516_v25 = vpop.permute.xlu1 %3515 }
 0x131   : > { %v3473_v38 = vunpack.i.h.bf16 %v5731_v1  ;;  %v3472_v54 = vunpack.i.l.bf16 %v5731_v1  ;;  %v1696_v46 = vsel %vm1678_vm6, %v6545_v20, %v3448_v37  ;;  %v1695_v40 = vsel %vm1678_vm6, %v6546_v6, %v3447_v50 }
 0x132   : > { %3795 = vrot.lane.b32.xlu1 %v3794_v52, %s3934_s6  ;;  %v1734_v11 = vsel %vm1715_vm7, %v1697_v59, %v3467_v32  ;;  %v1735_v35 = vsel %vm1715_vm7, %v1698_v27, %v3468_v16  ;;  %v1733_v49 = vsel %vm1715_vm7, %v1696_v46, %v3463_v24  ;;  %v1732_v22 = vsel %vm1715_vm7, %v1695_v40, %v3462_v62  ;;  %v3511_v16 = vpop.permute.xlu0 %3510 }
 0x133   : > { %3790 = vrot.lane.b32.xlu0 %v3789_v0, %s3934_s6  ;;  %v3483_v1 = vunpack.i.h.bf16 %v5769_v8  ;;  %v3482_v52 = vunpack.i.l.bf16 %v5769_v8  ;;  %v1771_v37 = vsel %vm1752_vm8, %v1734_v11, %v3477_v14  ;;  %v1772_v55 = vsel %vm1752_vm8, %v1735_v35, %v3478_v7  ;;  %s188_s6 = scalar_lea.vmem [#allocation2], %s2692_s4 }
 0x134   : > { %v3493_v50 = vunpack.i.h.bf16 %v5811_v12  ;;  %v3492_v32 = vunpack.i.l.bf16 %v5811_v12  ;;  %v1769_v0 = vsel %vm1752_vm8, %v1732_v22, %v3472_v54  ;;  %v1770_v24 = vsel %vm1752_vm8, %v1733_v49, %v3473_v38  ;;  %v5883_v38 = vpop.permute.xlu1 %3525  ;;  %s2604_s7 = sshll.u32 %s188_s6, 4  ;;  %s6359_s7 = int_to_ptr.vmem [resolvable:$true] %s2604_s7 }
 0x135   : > { %v3503_v46 = vunpack.i.h.bf16 %v3501_v43  ;;  %v3502_v62 = vunpack.i.l.bf16 %v3501_v43  ;;  %v3488_v8 = vunpack.i.h.bf16 %v5755_v3  ;;  %v3487_v27 = vunpack.i.l.bf16 %v5755_v3  ;;  %p3859_p1 = scmp.lt.s32.totalorder %s6359_s7, %s3857_s19 }
 0x136   : > { %3805 = vrot.lane.b32.xlu1 %v3804_v30, %s3935_s9  ;;  %v3513_v11 = vunpack.i.h.bf16 %v3511_v16  ;;  %v3512_v14 = vunpack.i.l.bf16 %v3511_v16  ;;  %v1806_v7 = vsel %vm1789_vm9, %v1769_v0, %v3482_v52  ;;  %v1807_v12 = vsel %vm1789_vm9, %v1770_v24, %v3483_v1  ;;  %v3521_v20 = vpop.permute.xlu0 %3520 }
 0x137   : > { %3800 = vrot.lane.b32.xlu0 %v3799_v63, %s3935_s9  ;;  %v3498_v35 = vunpack.i.h.bf16 %v5803_v58  ;;  %v3497_v59 = vunpack.i.l.bf16 %v5803_v58  ;;  %v1843_v30 = vsel %vm1826_vm10, %v1806_v7, %v3492_v32  ;;  %v1844_v43 = vsel %vm1826_vm10, %v1807_v12, %v3493_v50 }
 0x138   : > { %v3508_v3 = vunpack.i.h.bf16 %v5839_v57  ;;  %v3507_v54 = vunpack.i.l.bf16 %v5839_v57  ;;  %v1880_v63 = vsel %vm1863_vm11, %v1843_v30, %v3502_v62  ;;  %v1881_v6 = vsel %vm1863_vm11, %v1844_v43, %v3503_v46 }
 0x139   : > { %v3523_v40 = vunpack.i.h.bf16 %v3521_v20  ;;  %v3522_v49 = vunpack.i.l.bf16 %v3521_v20  ;;  %v3518_v58 = vunpack.i.h.bf16 %v3516_v25  ;;  %v3517_v22 = vunpack.i.l.bf16 %v3516_v25  ;;  %v3536_v0 = vpop.permute.xlu1 %3535 }
 0x13a   : > { %3815 = vrot.lane.b32.xlu1 %v3814_v13, %s3936_s18  ;;  %v1917_v1 = vsel %vm1900_vm12, %v1880_v63, %v3512_v14  ;;  %v1918_v52 = vsel %vm1900_vm12, %v1881_v6, %v3513_v11  ;;  %v1808_v57 = vsel %vm1789_vm9, %v1771_v37, %v3487_v27  ;;  %v1809_v50 = vsel %vm1789_vm9, %v1772_v55, %v3488_v8  ;;  %v3531_v24 = vpop.permute.xlu0 %3530 }
 0x13b   : > { %3810 = vrot.lane.b32.xlu0 %v5556_v4, %s3936_s18  ;;  %v1954_v32 = vsel %vm1937_vm13, %v1917_v1, %v3522_v49  ;;  %v1955_v16 = vsel %vm1937_vm13, %v1918_v52, %v3523_v40  ;;  %v1845_v15 = vsel %vm1826_vm10, %v1808_v57, %v3497_v59  ;;  %v1846_v13 = vsel %vm1826_vm10, %v1809_v50, %v3498_v35  ;;  %v6552_v1 = vld [vmem:[#allocation14_spill] sm:$0xff]  ;;  %s3852_s18 = scalar_lea.vmem %s6359_s7, 128 }
 0x13c   : > { %v1982_v25 = vpack.c.bf16 %v1955_v16, %v1954_v32  ;;  %v1567_v4 = vsel %vm1496_vm5, %v1564_v26, %v1566_v51  ;;  %v1882_v37 = vsel %vm1863_vm11, %v1845_v15, %v3507_v54  ;;  %v1883_v55 = vsel %vm1863_vm11, %v1846_v13, %v3508_v3  ;;  %v6553_v32 = vld [vmem:[#allocation13_spill] sm:$0xff]  ;;  %p3853_p12 = scmp.ne.s32.totalorder %s6359_s7, %s3852_s18  ;;  %p3860_p2 = scmp.lt.s32.totalorder %s3858_s21, %s3852_s18 }
 0x13d   : > { %v3533_v46 = vunpack.i.h.bf16 %v3531_v24  ;;  %v3532_v62 = vunpack.i.l.bf16 %v3531_v24  ;;  %v1919_v8 = vsel %vm1900_vm12, %v1882_v37, %v3517_v22  ;;  %v1920_v27 = vsel %vm1900_vm12, %v1883_v55, %v3518_v58  ;;  %v3546_v53 = vpop.permute.xlu1 %3545 }
 0x13e   : > { %3825 = vrot.lane.b32.xlu1 %v3824_v2, %s3937_s23  ;;  %2943 = vmatprep.mubr.msk.bf16.mxu0 %vm2012_vm14, %v1982_v25  ;;  %v1569_v11 = vsel %vm1496_vm5, %v1566_v51, %v5848_v33  ;;  %v6547_v2 = vrot.slane %v5681_v23, 6  ;;  %v6548_v7 = vrot.slane %v5430_v19, 6  ;;  %v6550_v51 = vpack.i.bf16 %v5801_v10, %v5798_v36  ;;  %p3854_p13 = pnand %p3853_p12, %p4004_p4  ;;  %p3861_p3 = por %p3860_p2, %p3859_p1 }
 0x13f   : > { %3820 = vrot.lane.b32.xlu0 %v3819_v29, %s3937_s23  ;;  %v1957_v14 = vsel %vm1937_vm13, %v1920_v27, %v3533_v46  ;;  %v1956_v56 = vsel %vm1937_vm13, %v1919_v8, %v3532_v62  ;;  %v3541_v29 = vpop.permute.xlu0 %3540  ;;  %v3844_v33 = vpack.i.bf16 %v1569_v11, %v1567_v4  ;;  %v6551_v19 = vpack.i.bf16 %v5823_v45, %v5820_v48 }
 0x140   : > { %v1563_v12 = vsel %vm1496_vm5, %v6548_v7, %v6547_v2  ;;  %v6549_v47 = vmov %v6547_v2  ;;  %v1983_v5 = vpack.c.bf16 %v1957_v14, %v1956_v56  ;;  %v3538_v30 = vunpack.i.h.bf16 %v3536_v0  ;;  %p3855_p0 = pneg %p3854_p13 }
 0x141   : > { %v1565_v21 = vsel %vm1496_vm5, %v6549_v47, %v1564_v26  ;;  %v3556_v35 = vpop.permute.xlu1 %3555  ;;  %v3537_v43 = vunpack.i.l.bf16 %v3536_v0  ;;  %v3528_v48 = vunpack.i.h.bf16 %v5883_v38  ;;  %v3527_v45 = vunpack.i.l.bf16 %v5883_v38  ;;  %v6554_v38 = vld [vmem:[#allocation12_spill] sm:$0xff] }
 0x142   : > { %3835 = vrot.lane.b32.xlu1 %v6550_v51, %s3938_s26  ;;  %2944 = vmatmul.mubr.msk.bf16.gmra.mrb[16].mxu0 %vm2012_vm14, %v1983_v5  ;;  %v3839_v31 = vpack.i.bf16 %v1565_v21, %v1563_v12  ;;  %v3548_v3 = vunpack.i.h.bf16 %v3546_v53  ;;  %v3547_v54 = vunpack.i.l.bf16 %v3546_v53  ;;  %v3543_v20 = vunpack.i.h.bf16 %v3541_v29  ;;  %p3862_p5 = pnand %p3861_p3, %p3855_p0 }
 0x143   : > { %3830 = vrot.lane.b32.xlu0 %v6551_v19, %s3938_s26  ;;  %v3551_v23 = vpop.permute.xlu0 %3550  ;;  %v3542_v63 = vunpack.i.l.bf16 %v3541_v29  ;;  %v3558_v40 = vunpack.i.h.bf16 %v3556_v35  ;;  %v3557_v49 = vunpack.i.l.bf16 %v3556_v35  ;;  %v1702_v22 = vsel %vm1678_vm6, %v4548_v17, %v3538_v30 }
 0x144   : > { %v1701_v52 = vsel %vm1678_vm6, %v6552_v1, %v3537_v43  ;;  %v3553_v57 = vunpack.i.h.bf16 %v3551_v23  ;;  %v3552_v50 = vunpack.i.l.bf16 %v3551_v23  ;;  %v1700_v16 = vsel %vm1678_vm6, %v6553_v32, %v3528_v48 }
 0x145   : > { %v5950_v26 = vpop.permute.xlu1 %3565  ;;  %v1699_v0 = vsel %vm1678_vm6, %v6554_v38, %v3527_v45  ;;  %v1738_v15 = vsel %vm1715_vm7, %v1701_v52, %v3547_v54  ;;  %v1739_v13 = vsel %vm1715_vm7, %v1702_v22, %v3548_v3  ;;  %v1737_v25 = vsel %vm1715_vm7, %v1700_v16, %v3543_v20 }
 0x146   : > { %3845 = vrot.lane.b32.xlu1 %v3844_v33, %s3939_s27  ;;  %v1736_v24 = vsel %vm1715_vm7, %v1699_v0, %v3542_v63  ;;  %v1775_v55 = vsel %vm1752_vm8, %v1738_v15, %v3557_v49  ;;  %v1776_v46 = vsel %vm1752_vm8, %v1739_v13, %v3558_v40  ;;  %v1774_v14 = vsel %vm1752_vm8, %v1737_v25, %v3553_v57 }
 0x147   : > { %3840 = vrot.lane.b32.xlu0 %v3839_v31, %s3939_s27  ;;  %v3561_v59 = vpop.permute.xlu0 %3560  ;;  %v1773_v11 = vsel %vm1752_vm8, %v1736_v24, %v3552_v50  ;;  %v3568_v2 = vunpack.i.h.bf16 %v5950_v26  ;;  %v3567_v7 = vunpack.i.l.bf16 %v5950_v26  ;;  %vm2584_vm0 = vcmask 1040384  }
 0x148   : > { %v3563_v17 = vunpack.i.h.bf16 %v3561_v59  ;;  %v3562_v4 = vunpack.i.l.bf16 %v3561_v59 }
 0x149   : > { %v5952_v36 = vpop.permute.xlu1 %3575  ;;  %v1812_v54 = vsel %vm1789_vm9, %v1775_v55, %v3567_v7  ;;  %v1813_v20 = vsel %vm1789_vm9, %v1776_v46, %v3568_v2 }
 0x14a   : > { %v1810_v21 = vsel %vm1789_vm9, %v1773_v11, %v3562_v4  ;;  %v1811_v5 = vsel %vm1789_vm9, %v1774_v14, %v3563_v17  ;;  %v3578_v29 = vunpack.i.h.bf16 %v5952_v36  ;;  %v3577_v51 = vunpack.i.l.bf16 %v5952_v36 }
 0x14b   : > { %v3571_v10 = vpop.permute.xlu0 %3570 }
 0x14c   : > { %v3573_v62 = vunpack.i.h.bf16 %v3571_v10  ;;  %v3572_v8 = vunpack.i.l.bf16 %v3571_v10  ;;  %v1849_v49 = vsel %vm1826_vm10, %v1812_v54, %v3577_v51 }
 0x14d   : > { %v3586_v6 = vpop.permute.xlu1 %3585 }
 0x14e   : > { %v1847_v19 = vsel %vm1826_vm10, %v1810_v21, %v3572_v8  ;;  %v1848_v31 = vsel %vm1826_vm10, %v1811_v5, %v3573_v62  ;;  %v3588_v35 = vunpack.i.h.bf16 %v3586_v6  ;;  %v3587_v23 = vunpack.i.l.bf16 %v3586_v6 }
 0x14f   : > { %v3581_v58 = vpop.permute.xlu0 %3580 }
 0x150   : > { %v3583_v56 = vunpack.i.h.bf16 %v3581_v58  ;;  %v3582_v53 = vunpack.i.l.bf16 %v3581_v58  ;;  %v1850_v58 = vsel %vm1826_vm10, %v1813_v20, %v3578_v29  ;;  %v1886_v52 = vsel %vm1863_vm11, %v1849_v49, %v3587_v23 }
 0x151   : > { %v3596_v37 = vpop.permute.xlu1 %3595  ;;  %v1887_v57 = vsel %vm1863_vm11, %v1850_v58, %v3588_v35  ;;  %v6555_v35 = vld [vmem:[#allocation16_spill] sm:$0xff] }
 0x152   : > { %v1884_v26 = vsel %vm1863_vm11, %v1847_v19, %v3582_v53  ;;  %v1885_v10 = vsel %vm1863_vm11, %v1848_v31, %v3583_v56  ;;  %v3598_v48 = vunpack.i.h.bf16 %v3596_v37  ;;  %v3597_v45 = vunpack.i.l.bf16 %v3596_v37 }
 0x153   : > { %v3591_v27 = vpop.permute.xlu0 %3590 }
 0x154   : > { %v3593_v12 = vunpack.i.h.bf16 %v3591_v27  ;;  %v3592_v47 = vunpack.i.l.bf16 %v3591_v27  ;;  %v1923_v16 = vsel %vm1900_vm12, %v1886_v52, %v3597_v45  ;;  %v1924_v38 = vsel %vm1900_vm12, %v1887_v57, %v3598_v48 }
 0x155   : > { %v3606_v33 = vpop.permute.xlu1 %3605 }
 0x156   : > { %v1921_v3 = vsel %vm1900_vm12, %v1884_v26, %v3592_v47  ;;  %v1922_v36 = vsel %vm1900_vm12, %v1885_v10, %v3593_v12  ;;  %v3608_v11 = vunpack.i.h.bf16 %v3606_v33  ;;  %v3607_v14 = vunpack.i.l.bf16 %v3606_v33  ;;  %v6556_v33 = vld [vmem:[#allocation15_spill] sm:$0xff] }
 0x157   : > { %v3601_v59 = vpop.permute.xlu0 %3600 }
 0x158   : > { %v3603_v30 = vunpack.i.h.bf16 %v3601_v59  ;;  %v3602_v43 = vunpack.i.l.bf16 %v3601_v59  ;;  %v1704_v23 = vsel %vm1678_vm6, %v6555_v35, %v3608_v11  ;;  %v1703_v59 = vsel %vm1678_vm6, %v6556_v33, %v3607_v14 }
 0x15a   : > { %v1958_v63 = vsel %vm1937_vm13, %v1921_v3, %v3602_v43  ;;  %v1959_v6 = vsel %vm1937_vm13, %v1922_v36, %v3603_v30  ;;  %v3616_v40 = vpop.permute.xlu1 %3615 }
 0x15b   : > { %v1984_v22 = vpack.c.bf16 %v1959_v6, %v1958_v63  ;;  %v3618_v8 = vunpack.i.h.bf16 %v3616_v40  ;;  %v3617_v27 = vunpack.i.l.bf16 %v3616_v40 }
 0x15c   : > { %v3611_v1 = vpop.permute.xlu0 %3610 }
 0x15d   : > { %v3613_v50 = vunpack.i.h.bf16 %v3611_v1  ;;  %v3612_v32 = vunpack.i.l.bf16 %v3611_v1  ;;  %2947 = vmatprep.mubr.msk.bf16.mxu0 %vm2012_vm14, %v1984_v22  ;;  %v1706_v29 = vsel %vm1678_vm6, %v4853_v9, %v3618_v8  ;;  %v1705_v51 = vsel %vm1678_vm6, %v4726_v60, %v3617_v27 }
 0x15e   : > { %v3626_v13 = vpop.permute.xlu1 %3625 }
 0x15f   : > { %v1961_v0 = vsel %vm1937_vm13, %v1924_v38, %v3613_v50  ;;  %v1960_v15 = vsel %vm1937_vm13, %v1923_v16, %v3612_v32  ;;  %v3628_v56 = vunpack.i.h.bf16 %v3626_v13  ;;  %v3627_v53 = vunpack.i.l.bf16 %v3626_v13 }
 0x160   : > { %v1985_v25 = vpack.c.bf16 %v1961_v0, %v1960_v15  ;;  %v3621_v24 = vpop.permute.xlu0 %3620 }
 0x161   : > { %v3623_v2 = vunpack.i.h.bf16 %v3621_v24  ;;  %v3622_v7 = vunpack.i.l.bf16 %v3621_v24  ;;  %v1742_v26 = vsel %vm1715_vm7, %v1705_v51, %v3627_v53  ;;  %v1743_v10 = vsel %vm1715_vm7, %v1706_v29, %v3628_v56 }
 0x162   : > { %2948 = vmatmul.mubr.msk.bf16.gmra.mrb[20].mxu0 %vm2012_vm14, %v1985_v25  ;;  %v3636_v17 = vpop.permute.xlu1 %3635 }
 0x163   : > { %v3638_v47 = vunpack.i.h.bf16 %v3636_v17  ;;  %v3637_v21 = vunpack.i.l.bf16 %v3636_v17  ;;  %v1741_v30 = vsel %vm1715_vm7, %v1704_v23, %v3623_v2  ;;  %v1740_v43 = vsel %vm1715_vm7, %v1703_v59, %v3622_v7 }
 0x164   : > { %v3631_v4 = vpop.permute.xlu0 %3630 }
 0x165   : > { %v3633_v19 = vunpack.i.h.bf16 %v3631_v4  ;;  %v3632_v31 = vunpack.i.l.bf16 %v3631_v4  ;;  %v1779_v60 = vsel %vm1752_vm8, %v1742_v26, %v3637_v21  ;;  %v1780_v3 = vsel %vm1752_vm8, %v1743_v10, %v3638_v47 }
 0x166   : > { %v5998_v37 = vpop.permute.xlu1 %3645 }
 0x167   : > { %v1777_v63 = vsel %vm1752_vm8, %v1740_v43, %v3632_v31  ;;  %v1778_v6 = vsel %vm1752_vm8, %v1741_v30, %v3633_v19  ;;  %v3648_v58 = vunpack.i.h.bf16 %v5998_v37  ;;  %v3647_v22 = vunpack.i.l.bf16 %v5998_v37 }
 0x168   : > { %v3641_v55 = vpop.permute.xlu0 %3640 }
 0x169   : > { %v3643_v9 = vunpack.i.h.bf16 %v3641_v55  ;;  %v3642_v48 = vunpack.i.l.bf16 %v3641_v55  ;;  %v1816_v11 = vsel %vm1789_vm9, %v1779_v60, %v3647_v22  ;;  %v1817_v14 = vsel %vm1789_vm9, %v1780_v3, %v3648_v58 }
 0x16a   : > { %v6000_v46 = vpop.permute.xlu1 %3655 }
 0x16b   : > { %v1814_v57 = vsel %vm1789_vm9, %v1777_v63, %v3642_v48  ;;  %v1815_v50 = vsel %vm1789_vm9, %v1778_v6, %v3643_v9  ;;  %v3658_v32 = vunpack.i.h.bf16 %v6000_v46  ;;  %v3657_v16 = vunpack.i.l.bf16 %v6000_v46 }
 0x16c   : > { %v3651_v62 = vpop.permute.xlu0 %3650 }
 0x16d   : > { %v3653_v36 = vunpack.i.h.bf16 %v3651_v62  ;;  %v3652_v54 = vunpack.i.l.bf16 %v3651_v62  ;;  %v1853_v7 = vsel %vm1826_vm10, %v1816_v11, %v3657_v16 }
 0x16e   : > { %v3666_v12 = vpop.permute.xlu1 %3665 }
 0x16f   : > { %v1851_v0 = vsel %vm1826_vm10, %v1814_v57, %v3652_v54  ;;  %v1852_v15 = vsel %vm1826_vm10, %v1815_v50, %v3653_v36  ;;  %v3668_v13 = vunpack.i.h.bf16 %v3666_v12  ;;  %v3667_v25 = vunpack.i.l.bf16 %v3666_v12 }
 0x170   : > { %v3661_v5 = vpop.permute.xlu0 %3660  ;;  %v1854_v12 = vsel %vm1826_vm10, %v1817_v14, %v3658_v32 }
 0x171   : > { %v3663_v40 = vunpack.i.h.bf16 %v3661_v5  ;;  %v3662_v49 = vunpack.i.l.bf16 %v3661_v5  ;;  %v1890_v5 = vsel %vm1863_vm11, %v1853_v7, %v3667_v25  ;;  %v1891_v29 = vsel %vm1863_vm11, %v1854_v12, %v3668_v13 }
 0x172   : > { %v3676_v45 = vpop.permute.xlu1 %3675 }
 0x173   : > { %v1888_v17 = vsel %vm1863_vm11, %v1851_v0, %v3662_v49  ;;  %v1889_v4 = vsel %vm1863_vm11, %v1852_v15, %v3663_v40  ;;  %v3678_v62 = vunpack.i.h.bf16 %v3676_v45  ;;  %v3677_v8 = vunpack.i.l.bf16 %v3676_v45 }
 0x174   : > { %v3671_v20 = vpop.permute.xlu0 %3670 }
 0x175   : > { %v3673_v1 = vunpack.i.h.bf16 %v3671_v20  ;;  %v3672_v52 = vunpack.i.l.bf16 %v3671_v20  ;;  %v1927_v31 = vsel %vm1900_vm12, %v1890_v5, %v3677_v8  ;;  %v1928_v35 = vsel %vm1900_vm12, %v1891_v29, %v3678_v62 }
 0x176   : > { %v3686_v38 = vpop.permute.xlu1 %3685 }
 0x177   : > { %v1925_v27 = vsel %vm1900_vm12, %v1888_v17, %v3672_v52  ;;  %v1926_v46 = vsel %vm1900_vm12, %v1889_v4, %v3673_v1  ;;  %v3688_v9 = vunpack.i.h.bf16 %v3686_v38  ;;  %v3687_v36 = vunpack.i.l.bf16 %v3686_v38 }
 0x178   : > { %v3681_v24 = vpop.permute.xlu0 %3680 }
 0x179   : > { %v3683_v37 = vunpack.i.h.bf16 %v3681_v24  ;;  %v3682_v55 = vunpack.i.l.bf16 %v3681_v24  ;;  %v1708_v40 = vsel %vm1678_vm6, %v4993_v42, %v3688_v9  ;;  %v1707_v50 = vsel %vm1678_vm6, %v4856_v18, %v3687_v36 }
 0x17a   : > { %v3696_v2 = vpop.permute.xlu1 %3695 }
 0x17b   : > { %v1962_v56 = vsel %vm1937_vm13, %v1925_v27, %v3682_v55  ;;  %v1963_v53 = vsel %vm1937_vm13, %v1926_v46, %v3683_v37  ;;  %v3698_v45 = vunpack.i.h.bf16 %v3696_v2  ;;  %v3697_v60 = vunpack.i.l.bf16 %v3696_v2 }
 0x17c   : > { %v1986_v47 = vpack.c.bf16 %v1963_v53, %v1962_v56  ;;  %v3691_v21 = vpop.permute.xlu0 %3690 }
 0x17d   : > { %v3693_v51 = vunpack.i.h.bf16 %v3691_v21  ;;  %v3692_v19 = vunpack.i.l.bf16 %v3691_v21  ;;  %v1710_v58 = vsel %vm1678_vm6, %v5125_v28, %v3698_v45  ;;  %v1709_v22 = vsel %vm1678_vm6, %v5027_v41, %v3697_v60 }
 0x17e   : > { %2951 = vmatprep.mubr.msk.bf16.mxu0 %vm2012_vm14, %v1986_v47  ;;  %v3706_v59 = vpop.permute.xlu1 %3705 }
 0x17f   : > { %v1965_v23 = vsel %vm1937_vm13, %v1928_v35, %v3693_v51  ;;  %v1964_v33 = vsel %vm1937_vm13, %v1927_v31, %v3692_v19  ;;  %v3708_v54 = vunpack.i.h.bf16 %v3706_v59  ;;  %v3707_v20 = vunpack.i.l.bf16 %v3706_v59 }
 0x180   : > { %v1987_v26 = vpack.c.bf16 %v1965_v23, %v1964_v33  ;;  %v3701_v10 = vpop.permute.xlu0 %3700 }
 0x181   : > { %v3703_v63 = vunpack.i.h.bf16 %v3701_v10  ;;  %v3702_v6 = vunpack.i.l.bf16 %v3701_v10  ;;  %v1746_v32 = vsel %vm1715_vm7, %v1709_v22, %v3707_v20  ;;  %v1747_v16 = vsel %vm1715_vm7, %v1710_v58, %v3708_v54 }
 0x182   : > { %2952 = vmatmul.mubr.msk.bf16.gmra.mrb[24].mxu0 %vm2012_vm14, %v1987_v26  ;;  %v3716_v30 = vpop.permute.xlu1 %3715 }
 0x183   : > { %v3718_v1 = vunpack.i.h.bf16 %v3716_v30  ;;  %v3717_v52 = vunpack.i.l.bf16 %v3716_v30  ;;  %v1745_v42 = vsel %vm1715_vm7, %v1708_v40, %v3703_v63  ;;  %v1744_v0 = vsel %vm1715_vm7, %v1707_v50, %v3702_v6 }
 0x184   : > { %v3711_v43 = vpop.permute.xlu0 %3710 }
 0x185   : > { %v3712_v38 = vunpack.i.l.bf16 %v3711_v43  ;;  %v3713_v15 = vunpack.i.h.bf16 %v3711_v43  ;;  %v1783_v4 = vsel %vm1752_vm8, %v1746_v32, %v3717_v52  ;;  %v1784_v18 = vsel %vm1752_vm8, %v1747_v16, %v3718_v1 }
 0x186   : > { %v3726_v48 = vpop.permute.xlu1 %3725 }
 0x187   : > { %v3727_v28 = vunpack.i.l.bf16 %v3726_v48  ;;  %v3728_v13 = vunpack.i.h.bf16 %v3726_v48  ;;  %v1781_v8 = vsel %vm1752_vm8, %v1744_v0, %v3712_v38  ;;  %v1782_v14 = vsel %vm1752_vm8, %v1745_v42, %v3713_v15 }
 0x188   : > { %v3721_v3 = vpop.permute.xlu0 %3720 }
 0x189   : > { %v3723_v25 = vunpack.i.h.bf16 %v3721_v3  ;;  %v3722_v41 = vunpack.i.l.bf16 %v3721_v3  ;;  %v1820_v56 = vsel %vm1789_vm9, %v1783_v4, %v3727_v28  ;;  %v1821_v7 = vsel %vm1789_vm9, %v1784_v18, %v3728_v13 }
 0x18a   : > { %v3736_v49 = vpop.permute.xlu1 %3735 }
 0x18b   : > { %v3737_v24 = vunpack.i.l.bf16 %v3736_v49  ;;  %v3738_v37 = vunpack.i.h.bf16 %v3736_v49  ;;  %v1818_v12 = vsel %vm1789_vm9, %v1781_v8, %v3722_v41  ;;  %v1819_v47 = vsel %vm1789_vm9, %v1782_v14, %v3723_v25 }
 0x18c   : > { %v3731_v57 = vpop.permute.xlu0 %3730 }
 0x18d   : > { %v3732_v55 = vunpack.i.l.bf16 %v3731_v57  ;;  %v3733_v27 = vunpack.i.h.bf16 %v3731_v57  ;;  %v1857_v21 = vsel %vm1826_vm10, %v1820_v56, %v3737_v24  ;;  %v1858_v29 = vsel %vm1826_vm10, %v1821_v7, %v3738_v37 }
 0x18e   : > { %v3746_v17 = vpop.permute.xlu1 %3745 }
 0x18f   : > { %v3748_v46 = vunpack.i.h.bf16 %v3746_v17  ;;  %v3747_v11 = vunpack.i.l.bf16 %v3746_v17  ;;  %v1855_v51 = vsel %vm1826_vm10, %v1818_v12, %v3732_v55  ;;  %v1856_v23 = vsel %vm1826_vm10, %v1819_v47, %v3733_v27 }
 0x190   : > { %v3741_v62 = vpop.permute.xlu0 %3740 }
 0x191   : > { %v3743_v53 = vunpack.i.h.bf16 %v3741_v62  ;;  %v3742_v2 = vunpack.i.l.bf16 %v3741_v62  ;;  %v1894_v33 = vsel %vm1863_vm11, %v1857_v21, %v3747_v11  ;;  %v1895_v59 = vsel %vm1863_vm11, %v1858_v29, %v3748_v46 }
 0x192   : > { %v6070_v10 = vpop.f32.mrb[0].mxu0 }
 0x193   : > { %v3756_v5 = vpop.permute.xlu1 %3755  ;;  %v1892_v30 = vsel %vm1863_vm11, %v1855_v51, %v3742_v2  ;;  %v1893_v43 = vsel %vm1863_vm11, %v1856_v23, %v3743_v53  ;;  %v6075_v45 = vpop.f32.mrb[1].mxu0  ;;  %v6081_v36 = vmul.f32 %v6070_v10, %v6070_v10 }
 0x194   : > { %v3758_v19 = vunpack.i.h.bf16 %v3756_v5  ;;  %v3757_v31 = vunpack.i.l.bf16 %v3756_v5  ;;  %v6085_v54 = vmul.f32 %v6075_v45, %v6075_v45  ;;  %v6087_v20 = vpop.f32.mrb[2].mxu0 }
 0x195   : > { %v3751_v35 = vpop.permute.xlu0 %3750  ;;  %v2991_v6 = vpack.c.bf16 %v6087_v20, %v6070_v10  ;;  %v6093_v40 = vmul.f32 %v6087_v20, %v6087_v20  ;;  %v6095_v1 = vpop.f32.mrb[3].mxu0 }
 0x196   : > { %v3752_v26 = vunpack.i.l.bf16 %v3751_v35  ;;  %v1931_v9 = vsel %vm1900_vm12, %v1894_v33, %v3757_v31  ;;  %v3753_v48 = vunpack.i.h.bf16 %v3751_v35  ;;  %v1932_v60 = vsel %vm1900_vm12, %v1895_v59, %v3758_v19 }
 0x197   : > { %v6099_v50 = vmul.f32 %v6095_v1, %v6095_v1  ;;  %v2987_v32 = vpack.c.bf16 %v6095_v1, %v6075_v45  ;;  %v3029_v38 = vpack.c.bf16 %v6093_v40, %v6081_v36 }
 0x198   : > { %v1929_v3 = vsel %vm1900_vm12, %v1892_v30, %v3752_v26  ;;  %v3766_v63 = vpop.permute.xlu1 %3765  ;;  %v1930_v16 = vsel %vm1900_vm12, %v1893_v43, %v3753_v48 }
 0x199   : > { %v3768_v49 = vunpack.i.h.bf16 %v3766_v63  ;;  %v3767_v58 = vunpack.i.l.bf16 %v3766_v63  ;;  %v3761_v22 = vpop.permute.xlu0 %3760  ;;  %v3025_v25 = vpack.c.bf16 %v6099_v50, %v6085_v54 }
 0x19a   : > { %v3763_v52 = vunpack.i.h.bf16 %v3761_v22  ;;  %v3762_v57 = vunpack.i.l.bf16 %v3761_v22 }
 0x19b   : > { %v1968_v42 = vsel %vm1937_vm13, %v1931_v9, %v3767_v58  ;;  %v1969_v0 = vsel %vm1937_vm13, %v1932_v60, %v3768_v49 }
 0x19c   : > { %v1989_v15 = vpack.c.bf16 %v1969_v0, %v1968_v42  ;;  %v1966_v28 = vsel %vm1937_vm13, %v1929_v3, %v3762_v57  ;;  %v1967_v13 = vsel %vm1937_vm13, %v1930_v16, %v3763_v52  ;;  %v3776_v41 = vpop.permute.xlu1 %3775 }
 0x19d   : > { %v1988_v24 = vpack.c.bf16 %v1967_v13, %v1966_v28  ;;  %v3771_v17 = vpop.permute.xlu0 %3770  ;;  %v3778_v62 = vunpack.i.h.bf16 %v3776_v41  ;;  %v3777_v27 = vunpack.i.l.bf16 %v3776_v41 }
 0x19e   : > { %v3773_v46 = vunpack.i.h.bf16 %v3771_v17  ;;  %v3772_v14 = vunpack.i.l.bf16 %v3771_v17 }
 0x19f   : > { %2955 = vmatprep.mubr.msk.bf16.mxu0 %vm2012_vm14, %v1988_v24  ;;  %v1714_v12 = vsel %vm1678_vm6, %v5421_v44, %v3778_v62  ;;  %v1713_v21 = vsel %vm1678_vm6, %v5338_v34, %v3777_v27 }
 0x1a0   : > { %2956 = vmatmul.mubr.msk.bf16.gmra.mrb[28].mxu0 %vm2012_vm14, %v1989_v15  ;;  %v3786_v4 = vpop.permute.xlu1 %3785  ;;  %v1712_v5 = vsel %vm1678_vm6, %v5333_v39, %v3773_v46  ;;  %v1711_v31 = vsel %vm1678_vm6, %v5128_v61, %v3772_v14 }
 0x1a1   : > { %v3781_v18 = vpop.permute.xlu0 %3780  ;;  %v3788_v56 = vunpack.i.h.bf16 %v3786_v4  ;;  %v3787_v53 = vunpack.i.l.bf16 %v3786_v4 }
 0x1a2   : > { %v3783_v2 = vunpack.i.h.bf16 %v3781_v18  ;;  %v3782_v7 = vunpack.i.l.bf16 %v3781_v18 }
 0x1a3   : > { %v1750_v35 = vsel %vm1715_vm7, %v1713_v21, %v3787_v53  ;;  %v1751_v23 = vsel %vm1715_vm7, %v1714_v12, %v3788_v56 }
 0x1a4   : > { %v3796_v37 = vpop.permute.xlu1 %3795  ;;  %v1748_v44 = vsel %vm1715_vm7, %v1711_v31, %v3782_v7  ;;  %v1749_v59 = vsel %vm1715_vm7, %v1712_v5, %v3783_v2 }
 0x1a5   : > { %v3791_v55 = vpop.permute.xlu0 %3790  ;;  %v3798_v29 = vunpack.i.h.bf16 %v3796_v37  ;;  %v3797_v51 = vunpack.i.l.bf16 %v3796_v37 }
 0x1a6   : > { %v3792_v33 = vunpack.i.l.bf16 %v3791_v55  ;;  %v3793_v26 = vunpack.i.h.bf16 %v3791_v55 }
 0x1a7   : > { %v1787_v60 = vsel %vm1752_vm8, %v1750_v35, %v3797_v51  ;;  %v1788_v61 = vsel %vm1752_vm8, %v1751_v23, %v3798_v29 }
 0x1a8   : > { %v3806_v8 = vpop.permute.xlu1 %3805  ;;  %v1785_v58 = vsel %vm1752_vm8, %v1748_v44, %v3792_v33  ;;  %v1786_v16 = vsel %vm1752_vm8, %v1749_v59, %v3793_v26 }
 0x1a9   : > { %v3801_v11 = vpop.permute.xlu0 %3800  ;;  %v3807_v34 = vunpack.i.l.bf16 %v3806_v8  ;;  %v3808_v30 = vunpack.i.h.bf16 %v3806_v8 }
 0x1aa   : > { %v3803_v43 = vunpack.i.h.bf16 %v3801_v11  ;;  %v3802_v39 = vunpack.i.l.bf16 %v3801_v11 }
 0x1ab   : > { %v1824_v42 = vsel %vm1789_vm9, %v1787_v60, %v3807_v34  ;;  %v1825_v28 = vsel %vm1789_vm9, %v1788_v61, %v3808_v30 }
 0x1ac   : > { %v3816_v47 = vpop.permute.xlu1 %3815  ;;  %v1822_v13 = vsel %vm1789_vm9, %v1785_v58, %v3802_v39  ;;  %v1823_v41 = vsel %vm1789_vm9, %v1786_v16, %v3803_v43 }
 0x1ad   : > { %v3811_v19 = vpop.permute.xlu0 %3810  ;;  %v3817_v9 = vunpack.i.l.bf16 %v3816_v47  ;;  %v3818_v3 = vunpack.i.h.bf16 %v3816_v47 }
 0x1ae   : > { %v3812_v63 = vunpack.i.l.bf16 %v3811_v19  ;;  %v3813_v22 = vunpack.i.h.bf16 %v3811_v19 }
 0x1af   : > { %v1861_v24 = vsel %vm1826_vm10, %v1824_v42, %v3817_v9  ;;  %v1862_v4 = vsel %vm1826_vm10, %v1825_v28, %v3818_v3 }
 0x1b0   : > { %v3826_v48 = vpop.permute.xlu1 %3825  ;;  %v1859_v18 = vsel %vm1826_vm10, %v1822_v13, %v3812_v63  ;;  %v1860_v8 = vsel %vm1826_vm10, %v1823_v41, %v3813_v22 }
 0x1b1   : > { %v3821_v49 = vpop.permute.xlu0 %3820  ;;  %v3828_v52 = vunpack.i.h.bf16 %v3826_v48  ;;  %v3827_v57 = vunpack.i.l.bf16 %v3826_v48  ;;  %v6140_v14 = vpop.f32.mrb[4].mxu0 }
 0x1b2   : > { %v3823_v0 = vunpack.i.h.bf16 %v3821_v49  ;;  %v3822_v15 = vunpack.i.l.bf16 %v3821_v49  ;;  %v6145_v12 = vpop.f32.mrb[5].mxu0  ;;  %v6151_v5 = vmul.f32 %v6140_v14, %v6140_v14 }
 0x1b3   : > { %v1898_v27 = vsel %vm1863_vm11, %v1861_v24, %v3827_v57  ;;  %v1899_v46 = vsel %vm1863_vm11, %v1862_v4, %v3828_v52  ;;  %v6155_v29 = vmul.f32 %v6145_v12, %v6145_v12  ;;  %v6157_v51 = vpop.f32.mrb[6].mxu0 }
 0x1b4   : > { %v3836_v17 = vpop.permute.xlu1 %3835  ;;  %v1896_v56 = vsel %vm1863_vm11, %v1859_v18, %v3822_v15  ;;  %v1897_v53 = vsel %vm1863_vm11, %v1860_v8, %v3823_v0  ;;  %v2999_v31 = vpack.c.bf16 %v6157_v51, %v6140_v14  ;;  %v6163_v35 = vmul.f32 %v6157_v51, %v6157_v51  ;;  %v6165_v59 = vpop.f32.mrb[7].mxu0 }
 0x1b5   : > { %v3838_v37 = vunpack.i.h.bf16 %v3836_v17  ;;  %v3837_v55 = vunpack.i.l.bf16 %v3836_v17  ;;  %v3831_v62 = vpop.permute.xlu0 %3830  ;;  %v2995_v30 = vpack.c.bf16 %v6165_v59, %v6145_v12  ;;  %v6171_v43 = vmul.f32 %v6165_v59, %v6165_v59 }
 0x1b6   : > { %v3832_v11 = vunpack.i.l.bf16 %v3831_v62  ;;  %v3833_v7 = vunpack.i.h.bf16 %v3831_v62  ;;  %v6558_v50 = vpack.c.bf16 %v6163_v35, %v6151_v5 }
 0x1b7   : > { %v1935_v2 = vsel %vm1900_vm12, %v1898_v27, %v3837_v55  ;;  %v1936_v47 = vsel %vm1900_vm12, %v1899_v46, %v3838_v37  ;;  %v3033_v49 = vpack.c.bf16 %v6171_v43, %v6155_v29 }
 0x1b8   : > { %v1933_v21 = vsel %vm1900_vm12, %v1896_v56, %v3832_v11  ;;  %v3846_v19 = vpop.permute.xlu1 %3845  ;;  %v1934_v39 = vsel %vm1900_vm12, %v1897_v53, %v3833_v7  ;;  %v2249_v7 = vlaneseq }
 0x1b9   : > { %v3848_v23 = vunpack.i.h.bf16 %v3846_v19  ;;  %v3847_v33 = vunpack.i.l.bf16 %v3846_v19  ;;  %v3841_v44 = vpop.permute.xlu0 %3840  ;;  %v2247_v19 = vld [vmem:[%s6406_s2] sm:$0x7] }
 0x1ba   : > { %v3843_v26 = vunpack.i.h.bf16 %v3841_v44  ;;  %v3842_v34 = vunpack.i.l.bf16 %v3841_v44 }
 0x1bb   : > { %v1972_v48 = vsel %vm1937_vm13, %v1935_v2, %v3847_v33  ;;  %v1973_v60 = vsel %vm1937_vm13, %v1936_v47, %v3848_v23  ;;  %v2250_v47 = vshrl.u32 %v2249_v7, 7 }
 0x1bc   : > { %v1991_v61 = vpack.c.bf16 %v1973_v60, %v1972_v48  ;;  %v1970_v3 = vsel %vm1937_vm13, %v1933_v21, %v3842_v34  ;;  %v1971_v63 = vsel %vm1937_vm13, %v1934_v39, %v3843_v26 }
 0x1bd   : > { %v1990_v58 = vpack.c.bf16 %v1971_v63, %v1970_v3  ;;  %v2255_v21 = vsub.s32 1, %v2250_v47  ;;  %v2251_v23 = vsub.s32 0, %v2250_v47  ;;  %v2259_v63 = vsub.s32 2, %v2250_v47 }
 0x1bf   : > { %2959 = vmatprep.mubr.msk.bf16.mxu0 %vm2012_vm14, %v1990_v58  ;;  %v6251_v33 = vrot.slane %v2247_v19, %v2255_v21  ;;  %v6253_v26 = vrot.slane %v2247_v19, %v2251_v23  ;;  %v6266_v53 = vrot.slane %v2247_v19, %v2259_v63 }
 0x1c0   : > { %2960 = vmatmul.mubr.msk.bf16.gmra.mrb[32].mxu0 %vm2012_vm14, %v1991_v61 }
 0x1c1   : > { %2329 = vmatprep.mubr.f32.mxu1 %v6251_v33 }
 0x1d3   : > { %v6184_v22 = vpop.f32.mrb[8].mxu0 }
 0x1d4   : > { %v6186_v52 = vpop.f32.mrb[9].mxu0  ;;  %v6192_v16 = vmul.f32 %v6184_v22, %v6184_v22 }
 0x1d5   : > { %v6188_v57 = vpop.f32.mrb[10].mxu0  ;;  %v6204_v28 = vmul.f32 %v6186_v52, %v6186_v52 }
 0x1d6   : > { %v3007_v42 = vpack.c.bf16 %v6188_v57, %v6184_v22  ;;  %v6198_v0 = vmul.f32 %v6188_v57, %v6188_v57  ;;  %v6200_v15 = vpop.f32.mrb[11].mxu0  ;;  %v3940_v22 = vmov 0.0|0.0  }
 0x1d7   : > { %v3003_v13 = vpack.c.bf16 %v6200_v15, %v6186_v52  ;;  %v6210_v41 = vmul.f32 %v6200_v15, %v6200_v15  ;;  %v3942_v52 = vmov 0.0  }
 0x1d8   : > { %v6560_v40 = vpack.c.bf16 %v6198_v0, %v6192_v16 }
 0x1d9   : > { %v6559_v36 = vpack.c.bf16 %v6210_v41, %v6204_v28 }
 0x1f3   : > { %v6216_v4 = vpop.f32.mrb[12].mxu0 }
 0x1f4   : > { %v6218_v18 = vpop.f32.mrb[13].mxu0  ;;  %v6224_v55 = vmul.f32 %v6216_v4, %v6216_v4 }
 0x1f5   : > { %v6220_v37 = vpop.f32.mrb[14].mxu0  ;;  %v6236_v46 = vmul.f32 %v6218_v18, %v6218_v18 }
 0x1f6   : > { %v3015_v62 = vpack.c.bf16 %v6220_v37, %v6216_v4  ;;  %v6230_v8 = vmul.f32 %v6220_v37, %v6220_v37  ;;  %v6232_v27 = vpop.f32.mrb[15].mxu0 }
 0x1f7   : > { %v3011_v11 = vpack.c.bf16 %v6232_v27, %v6218_v18  ;;  %v6242_v56 = vmul.f32 %v6232_v27, %v6232_v27 }
 0x215   : > { %v2945_v44 = vpop.f32.mrb[16].mxu0 }
 0x216   : > { %v2168_v34 = vpop.f32.mrb[17].mxu0  ;;  %v6256_v48 = vmul.f32 %v2945_v44, %v2945_v44 }
 0x217   : > { %v2946_v39 = vpop.f32.mrb[18].mxu0  ;;  %v6260_v58 = vmul.f32 %v2168_v34, %v2168_v34 }
 0x218   : > { %v2989_v60 = vpack.c.bf16 %v2946_v39, %v2945_v44  ;;  %v6258_v61 = vmul.f32 %v2946_v39, %v2946_v39  ;;  %v2171_v3 = vpop.f32.mrb[19].mxu0 }
 0x219   : > { %v6262_v7 = vmul.f32 %v2171_v3, %v2171_v3  ;;  %v2985_v21 = vpack.c.bf16 %v2171_v3, %v2168_v34 }
 0x21a   : > { %v3027_v23 = vpack.c.bf16 %v6258_v61, %v6256_v48 }
 0x21b   : > { %v3023_v2 = vpack.c.bf16 %v6262_v7, %v6260_v58  ;;  %2986 = vmatprep.subr.bf16.mxu1 %v2985_v21 }
 0x21c   : > { %2988 = vmatpush3.bf16.msra.mxu1 %v2987_v32 }
 0x21d   : > { %2990 = vmatprep.subr.bf16.mxu1 %v2989_v60 }
 0x220   : > { %2992 = vmatpush3.bf16.msra.mxu1 %v2991_v6 }
 0x235   : > { %v2949_v47 = vpop.f32.mrb[20].mxu0 }
 0x236   : > { %v2184_v44 = vpop.f32.mrb[21].mxu0  ;;  %v6276_v39 = vmul.f32 %v2949_v47, %v2949_v47 }
 0x237   : > { %v2950_v34 = vpop.f32.mrb[22].mxu0  ;;  %v6280_v24 = vmul.f32 %v2184_v44, %v2184_v44 }
 0x238   : > { %v2997_v19 = vpack.c.bf16 %v2950_v34, %v2949_v47  ;;  %v6278_v3 = vmul.f32 %v2950_v34, %v2950_v34  ;;  %v2187_v63 = vpop.f32.mrb[23].mxu0 }
 0x239   : > { %v2993_v21 = vpack.c.bf16 %v2187_v63, %v2184_v44  ;;  %v6282_v17 = vmul.f32 %v2187_v63, %v2187_v63 }
 0x23a   : > { %v6557_v54 = vpack.c.bf16 %v6278_v3, %v6276_v39 }
 0x23b   : > { %v3031_v10 = vpack.c.bf16 %v6282_v17, %v6280_v24  ;;  %2994 = vmatprep.subr.bf16.mxu1 %v2993_v21 }
 0x23c   : > { %2996 = vmatpush3.bf16.msra.mxu1 %v2995_v30 }
 0x23d   : > { %2998 = vmatprep.subr.bf16.mxu1 %v2997_v19 }
 0x240   : > { %3000 = vmatpush3.bf16.msra.mxu1 %v2999_v31 }
 0x255   : > { %v2953_v20 = vpop.f32.mrb[24].mxu0 }
 0x256   : > { %v2200_v6 = vpop.f32.mrb[25].mxu0  ;;  %v2431_v32 = vmul.f32 %v2953_v20, %v2953_v20 }
 0x257   : > { %v2954_v1 = vpop.f32.mrb[26].mxu0  ;;  %v2429_v34 = vmul.f32 %v2200_v6, %v2200_v6 }
 0x258   : > { %v3005_v60 = vpack.c.bf16 %v2954_v1, %v2953_v20  ;;  %v2432_v47 = vmul.f32 %v2954_v1, %v2954_v1  ;;  %v2203_v44 = vpop.f32.mrb[27].mxu0 }
 0x259   : > { %v3001_v63 = vpack.c.bf16 %v2203_v44, %v2200_v6  ;;  %v2430_v9 = vmul.f32 %v2203_v44, %v2203_v44 }
 0x25a   : > { %v3043_v21 = vpack.c.bf16 %v2432_v47, %v2431_v32 }
 0x25b   : > { %v3039_v45 = vpack.c.bf16 %v2430_v9, %v2429_v34  ;;  %3002 = vmatprep.subr.bf16.mxu1 %v3001_v63 }
 0x25c   : > { %3004 = vmatpush3.bf16.msra.mxu1 %v3003_v13 }
 0x25d   : > { %3006 = vmatprep.subr.bf16.mxu1 %v3005_v60 }
 0x260   : > { %3008 = vmatpush3.bf16.msra.mxu1 %v3007_v42 }
 0x273   : > { %v2957_v14 = vpop.f32.mrb[28].mxu0 }
 0x274   : > { %v2216_v12 = vpop.f32.mrb[29].mxu0  ;;  %v2435_v31 = vmul.f32 %v2957_v14, %v2957_v14 }
 0x275   : > { %v2958_v51 = vpop.f32.mrb[30].mxu0  ;;  %v2433_v20 = vmul.f32 %v2216_v12, %v2216_v12 }
 0x276   : > { %v3013_v59 = vpack.c.bf16 %v2958_v51, %v2957_v14  ;;  %v2436_v30 = vmul.f32 %v2958_v51, %v2958_v51  ;;  %v2219_v19 = vpop.f32.mrb[31].mxu0 }
 0x277   : > { %v3009_v6 = vpack.c.bf16 %v2219_v19, %v2216_v12  ;;  %v2434_v9 = vmul.f32 %v2219_v19, %v2219_v19 }
 0x278   : > { %v3051_v1 = vpack.c.bf16 %v2436_v30, %v2435_v31 }
 0x279   : > { %v3047_v32 = vpack.c.bf16 %v2434_v9, %v2433_v20  ;;  %3010 = vmatprep.subr.bf16.mxu1 %v3009_v6 }
 0x27a   : > { %3012 = vmatpush3.bf16.msra.mxu1 %v3011_v11 }
 0x27b   : > { %3014 = vmatprep.subr.bf16.mxu1 %v3013_v59 }
 0x27e   : > { %3016 = vmatpush3.bf16.msra.mxu1 %v3015_v62 }
 0x27f   : > { %3017 = vmatprep.subr.bf16.mxu1 %v3940_v22 }
 0x281   : > { %2330 = vmatmul.mubr.f32.vlgmr.msra.gmra.mrb[0].mxu1 %v6253_v26 }
 0x282   : > { %2971 = vmatprep.mubr.msk.f32.mxu1 %vm3941_vm15, %v3942_v52 }
 0x293   : > { %v2961_v57 = vpop.f32.mrb[32].mxu0 }
 0x294   : > { %v2232_v42 = vpop.f32.mrb[33].mxu0  ;;  %v2439_v13 = vmul.f32 %v2961_v57, %v2961_v57 }
 0x295   : > { %v2962_v15 = vpop.f32.mrb[34].mxu0  ;;  %v2437_v11 = vmul.f32 %v2232_v42, %v2232_v42 }
 0x296   : > { %v3021_v60 = vpack.c.bf16 %v2962_v15, %v2961_v57  ;;  %v2440_v18 = vmul.f32 %v2962_v15, %v2962_v15  ;;  %v2235_v27 = vpop.f32.mrb[35].mxu0 }
 0x297   : > { %v3018_v47 = vpack.c.bf16 %v2235_v27, %v2232_v42  ;;  %v2438_v44 = vmul.f32 %v2235_v27, %v2235_v27 }
 0x298   : > { %v3059_v4 = vpack.c.bf16 %v2440_v18, %v2439_v13 }
 0x299   : > { %v3056_v37 = vpack.c.bf16 %v2438_v44, %v2437_v11  ;;  %3019 = vmatpush3.bf16.msra.mxu1 %v3018_v47 }
 0x29a   : > { %3020 = vmatprep.subr.bf16.mxu1 %v3940_v22 }
 0x29d   : > { %3022 = vmatpush3.bf16.msra.mxu1 %v3021_v60 }
 0x29e   : > { %3024 = vmatprep.subr.bf16.mxu1 %v3023_v2 }
 0x2a0   : > { %2972 = vmatmul.mubr.msk.f32.vlgmr.msra.gmra.mrb[2].mxu1 %vm1937_vm13, %v6266_v53 }
 0x2a1   : > { %3026 = vmatpush3.bf16.msra.mxu1 %v3025_v25  ;;  %2505 = vmatprep.mubr.f32.mxu1 %v6251_v33  ;;  %v6562_v25 = vpack.c.bf16 %v6230_v8, %v6224_v55 }
 0x2a2   : > { %3028 = vmatprep.subr.bf16.mxu1 %v3027_v23 }
 0x2a5   : > { %3030 = vmatpush3.bf16.msra.mxu1 %v3029_v38  ;;  %v6561_v38 = vpack.c.bf16 %v6242_v56, %v6236_v46 }
 0x2a6   : > { %3032 = vmatprep.subr.bf16.mxu1 %v3031_v10 }
 0x2a9   : > { %3034 = vmatpush3.bf16.msra.mxu1 %v3033_v49 }
 0x2aa   : > { %3036 = vmatprep.subr.bf16.mxu1 %v6557_v54 }
 0x2ad   : > { %3038 = vmatpush3.bf16.msra.mxu1 %v6558_v50 }
 0x2ae   : > { %3040 = vmatprep.subr.bf16.mxu1 %v3039_v45 }
 0x2b1   : > { %3042 = vmatpush3.bf16.msra.mxu1 %v6559_v36 }
 0x2b2   : > { %3044 = vmatprep.subr.bf16.mxu1 %v3043_v21 }
 0x2b5   : > { %3046 = vmatpush3.bf16.msra.mxu1 %v6560_v40 }
 0x2b6   : > { %3048 = vmatprep.subr.bf16.mxu1 %v3047_v32 }
 0x2b9   : > { %3050 = vmatpush3.bf16.msra.mxu1 %v6561_v38 }
 0x2ba   : > { %3052 = vmatprep.subr.bf16.mxu1 %v3051_v1 }
 0x2bd   : > { %3054 = vmatpush3.bf16.msra.mxu1 %v6562_v25 }
 0x2be   : > { %3055 = vmatprep.subr.bf16.mxu1 %v3940_v22 }
 0x2c0   : > { %2506 = vmatmul.mubr.f32.vlgmr.msra.gmra.mrb[4].mxu1 %v6253_v26 }
 0x2c1   : > { %3057 = vmatpush3.bf16.msra.mxu1 %v3056_v37  ;;  %2982 = vmatprep.mubr.msk.f32.mxu1 %vm3941_vm15, %v3942_v52 }
 0x2c2   : > { %3058 = vmatprep.subr.bf16.mxu1 %v3940_v22 }
 0x2c5   : > { %3060 = vmatpush3.bf16.msra.mxu1 %v3059_v4 }
 0x2c8   : > { %2983 = vmatmul.mubr.msk.f32.vlgmr.msra.gmra.mrb[6].mxu1 %vm1937_vm13, %v6266_v53 }
 0x354   : > { %v2873_v5 = vpop.f32.mrb[0].mxu1 }
 0x355   : > { %v2874_v29 = vpop.f32.mrb[1].mxu1 }
 0x356   : > { %v2875_v35 = vadd.f32 %v2874_v29, %v2873_v5 }
 0x373   : > { %v2401_v43 = vpop.f32.mrb[2].mxu1 }
 0x374   : > { %v2402_v49 = vadd.f32 %v2875_v35, %v2401_v43  ;;  %v2973_v16 = vpop.f32.mrb[3].mxu1 }
 0x393   : > { %v2913_v0 = vpop.f32.mrb[4].mxu1 }
 0x394   : > { %v2914_v28 = vpop.f32.mrb[5].mxu1 }
 0x395   : > { %v2915_v41 = vadd.f32 %v2914_v28, %v2913_v0 }
 0x39b   : > { %v2577_v24 = vpop.f32.mrb[6].mxu1 }
 0x39c   : > { %v2578_v17 = vadd.f32 %v2915_v41, %v2577_v24  ;;  %v2984_v55 = vpop.f32.mrb[7].mxu1 }
 0x39e   : > { %v2582_v62 = vrot.slane %v2578_v17, 7 }
 0x3a0   : > { %v2585_v8 = vsel %vm2584_vm0, %v2402_v49, %v2582_v62 }
 0x3a1   : > { %v2586_v46 = vsel %vm1496_vm5, %v2585_v8, 0.0 }
 0x3a2   : > { %2589 = vst [vmem:[%s188_s6] sm:$0xff] %v2586_v46 }
 0x3a3   : > { %3865 = shalt.err (!%p3862_p5)
}
 0x3a4   : > { %s3866_s23 = scalar_lea.hbm %s6357_s10, 128  ;;  %s3870_s28 = scalar_lea.hbm %s6407_s3, 256 }
 0x3a5   : > { %p3867_p6 = scmp.ne.s32.totalorder %s6357_s10, %s3866_s23  ;;  %p3871_p10 = scmp.lt.u32.totalorder %s6357_s10, %s6407_s3 }
 0x3a6   : > { %p3872_p11 = scmp.lt.u32.totalorder %s3870_s28, %s3866_s23  ;;  %p3874_p13 = scmp.lt.u32.totalorder %s3866_s23, %s6357_s10 }
 0x3a7   : > { %p3868_p7 = pnand %p3867_p6, %p4004_p4 }
 0x3a8   : > { %p3873_p12 = por %p3872_p11, %p3871_p10 }
 0x3a9   : > { %p3869_p9 = pneg %p3868_p7 }
 0x3aa   : > { %p3875_p0 = por %p3874_p13, %p3873_p12 }
 0x3ac   : > { %p3876_p1 = pnand %p3875_p0, %p3869_p9 }
 0x3ae   : > { %3879 = shalt.err (!%p3876_p1)
}
 0x3af   : > { %3063 = dma.vmem_to_hbm [thread:$0]  (%p4004_p4), %s6359_s7, 128, %s6357_s10, %s2591_s11  }
 0x3b0 PF: > { %p3069_p2 = scmp.ge.s32.totalorder %s3930_s17, 2  ;;  %s2616_s4 = sand.u32 1, %s3910_s12  }
 0x3b1   : > { %s2617_s5 = scalar_lea.sflag [#allocation3], %s2616_s4 }
 0x3b2   : > { %p3066_p3 = pnand %p3069_p2, %p4011_p8 }
 0x3b4   : > { %3905 = dma.done.wait (!%p3066_p3), %s2617_s5, 128  }
 0x3b5   : > { %3907 = vsyncadd (!%p3066_p3), %s2617_s5, 4294967168  ;;  %s16_s17 = sadd.s32 1, %s3930_s17   ;;  %s6563_s12 = smov %s3914_s13 }
 0x3b6   : > { %p13_p5 = scmp.ge.s32.totalorder %s16_s17, 4   ;;  %s6564_s13 = smov %s3918_s14 }
 0x3b7   : > { %s6565_s14 = smov %s4017_s25  ;;  %s6566_s15 = smov %s3926_s16 }
 0x3b8   : > { %s6567_s16 = smov %s6569_s20  ;;  %15 = sbr.rel (!%p13_p5) target bundleno = 4 (0x4), region = 74 }
 0x3bf   :  { %2622 = vsyncpa [#allocation3], 1 }
 0x3c0   :  { %2624 = vsyncpa [#allocation3 + $0x1], 1 }

</bundles_post_ra>
